<compile_context>
chip_gen: v7x
topology: tpu7x:2x2x1
jax: 0.10.0
libtpu: 0.0.40
codegen_flags: <defaults>
</compile_context>

<pallas_src>
import math

import jax
import jax.numpy as jnp
from jax import lax
from jax.experimental import pallas as pl
from jax.experimental.pallas import tpu as pltpu


def _make_kernel(bc: int, S: int, D: int, scale: float, alpha: float,
                 n_iter: int = 30):
    """Builds the fused S_ATT kernel for one (bc, S, D) block."""
    if alpha <= 1.0:
        raise ValueError("entmax alpha must be strictly > 1")

    am1 = alpha - 1.0
    inv_am1 = 1.0 / am1
    score_mult = am1 / scale                 # fold (alpha-1) and 1/scale
    dm0_const = 1.0 - float(S) ** (-am1)     # tau_hi0 - tau_lo0 (constant)

    # p(z) = clamp(z, 0) ** (1/(alpha-1)), special-cased for common alphas.
    if abs(alpha - 1.5) < 1e-12:
        def _p(z):
            zc = jnp.maximum(z, 0.0)
            return zc * zc                   # power 2: pure VPU
    elif abs(alpha - 2.0) < 1e-12:
        def _p(z):
            return jnp.maximum(z, 0.0)       # power 1
    else:
        def _p(z):
            zc = jnp.maximum(z, 1e-30)
            p = jnp.exp(inv_am1 * jnp.log(zc))   # EUP path (generic alpha)
            return jnp.where(z > 0.0, p, 0.0)

    def kernel(x_ref, wq_ref, bq_ref, w1_ref, b1_ref, w2_ref, b2_ref,
               g_ref, beta_ref, out_ref):
        x3 = x_ref[...]                                  # (bc, S, D) f32
        xf = x3.reshape(bc * S, D)                       # flat rows (no-op relayout)

        # ---- q = drop_q(relu(linear_q(x)))  (dropout = identity) ----
        q = jnp.maximum(
            jnp.dot(xf, wq_ref[...], preferred_element_type=jnp.float32)
            + bq_ref[...], 0.0)
        q3 = q.reshape(bc, S, D)

        # ---- attention scores, with (alpha-1)/scale folded in ----
        raw = jnp.einsum('bqd,bkd->bqk', q3, x3,
                         preferred_element_type=jnp.float32)   # (bc, S, S)
        Xs = raw * score_mult                                  # = scores*(a-1)/scale

        # ---- entmax_bisect(scores, alpha, dim=-1) ----
        max_val = jnp.max(Xs, axis=-1, keepdims=True)
        tau_lo = max_val - 1.0                                 # 1 ** (alpha-1)
        f_lo = jnp.sum(_p(Xs - tau_lo), axis=-1, keepdims=True) - 1.0

        # Fully unrolled bisection; dm halving is a Python constant, folded at
        # trace time, so only the sub/clamp/square/reduce/select chain remains.
        dm = dm0_const
        p_m = jnp.zeros_like(Xs)
        for _ in range(n_iter):
            dm *= 0.5
            tau_m = tau_lo + dm
            p_m = _p(Xs - tau_m)
            f_m = jnp.sum(p_m, axis=-1, keepdims=True) - 1.0
            tau_lo = jnp.where(f_m * f_lo >= 0.0, tau_m, tau_lo)

        attn = p_m / jnp.sum(p_m, axis=-1, keepdims=True)      # ensure_sum_one
        # drop_attn = identity (inference)

        # ---- attention_result = attn @ v,  v = x ----
        ar3 = jnp.einsum('bqk,bkd->bqd', attn, x3,
                         preferred_element_type=jnp.float32)   # (bc, S, D)
        arf = ar3.reshape(bc * S, D)

        # ---- ffn: Linear -> ReLU -> Linear -> Dropout(identity) ----
        h = jnp.maximum(
            jnp.dot(arf, w1_ref[...], preferred_element_type=jnp.float32)
            + b1_ref[...], 0.0)
        h = jnp.dot(h, w2_ref[...], preferred_element_type=jnp.float32) + b2_ref[...]

        # ---- C_hat = LayerNorm(ffn(ar) + ar), eps = 1e-12 ----
        y = h + arf
        mu = jnp.mean(y, axis=-1, keepdims=True)
        var = jnp.mean((y - mu) ** 2, axis=-1, keepdims=True)
        yn = (y - mu) * lax.rsqrt(var + 1e-12)
        out = yn * g_ref[...] + beta_ref[...]
        out_ref[...] = out.reshape(bc, S, D)

    return kernel


def s_att_forward(x, params, alpha, emb_size, *, n_iter=30, batch_chunk=None):
    """x: (B, S, 2*emb_size) f32. Returns (C, target_emb) like the PyTorch module.

    batch_chunk=None fuses the whole batch into one grid step (best on v5e/v6e
    for small B); pass batch_chunk=B//2 to expose a 'parallel' batch axis for
    v7x's 2 TensorCores or to bound the per-step VMEM footprint.
    """
    B, S, D = x.shape
    assert D == 2 * emb_size
    bc = B if batch_chunk is None else batch_chunk
    assert B % bc == 0, "batch_chunk must divide B"
    scale = math.sqrt(2 * emb_size)
    wq, bq, w1, b1, w2, b2, gamma, beta = params

    def full_spec(shape):
        n = len(shape)
        return pl.BlockSpec(shape, lambda i, n=n: (0,) * n)

    C_hat = pl.pallas_call(
        _make_kernel(bc, S, D, scale, float(alpha), n_iter),
        out_shape=jax.ShapeDtypeStruct((B, S, D), jnp.float32),
        grid_spec=pltpu.PrefetchScalarGridSpec(
            num_scalar_prefetch=0,
            grid=(B // bc,),
            in_specs=[
                pl.BlockSpec((bc, S, D), lambda i: (i, 0, 0)),   # x
                full_spec((D, D)), full_spec((1, D)),            # linear_q W, b
                full_spec((D, D)), full_spec((1, D)),            # ffn.0 W, b
                full_spec((D, D)), full_spec((1, D)),            # ffn.2 W, b
                full_spec((1, D)), full_spec((1, D)),            # layer_norm g, b
            ],
            out_specs=pl.BlockSpec((bc, S, D), lambda i: (i, 0, 0)),
        ),
        compiler_params=pltpu.CompilerParams(
            dimension_semantics=("parallel",)),
    )(x, wq, bq, w1, b1, w2, b2, gamma, beta)

    C = C_hat[:, :-1, :]
    target_emb = C_hat[:, -1, :]
    return C, target_emb


# ---------------- pure-JAX reference (matches PyTorch S_ATT, n_iter=50) -------
def _entmax_bisect_ref(scores, alpha, n_iter=50):
    d = scores.shape[-1]
    am1 = alpha - 1.0
    X = scores * am1
    max_val = jnp.max(X, axis=-1, keepdims=True)
    tau_lo = max_val - 1.0
    tau_hi = max_val - (1.0 / d) ** am1

    def p(z):
        return jnp.clip(z, 0.0, None) ** (1.0 / am1)

    f_lo = jnp.sum(p(X - tau_lo), axis=-1, keepdims=True) - 1.0
    dm = tau_hi - tau_lo
    p_m = jnp.zeros_like(X)
    for _ in range(n_iter):
        dm = dm / 2.0
        tau_m = tau_lo + dm
        p_m = p(X - tau_m)
        f_m = jnp.sum(p_m, axis=-1, keepdims=True) - 1.0
        tau_lo = jnp.where(f_m * f_lo >= 0.0, tau_m, tau_lo)
    return p_m / jnp.sum(p_m, axis=-1, keepdims=True)


def _s_att_ref(x, params, alpha, emb_size):
    wq, bq, w1, b1, w2, b2, gamma, beta = params
    scale = math.sqrt(2 * emb_size)
    q = jax.nn.relu(x @ wq + bq)
    scores = jnp.einsum('bqd,bkd->bqk', q, x) / scale
    attn = _entmax_bisect_ref(scores, alpha, n_iter=50)
    ar = jnp.einsum('bqk,bkd->bqd', attn, x)
    h = jax.nn.relu(ar @ w1 + b1)
    h = h @ w2 + b2
    y = h + ar
    mu = jnp.mean(y, axis=-1, keepdims=True)
    var = jnp.mean((y - mu) ** 2, axis=-1, keepdims=True)
    out = (y - mu) * lax.rsqrt(var + 1e-12) * gamma + beta
    return out[:, :-1, :], out[:, -1, :]


if __name__ == "__main__":
    emb_size = 16
    D = 2 * emb_size      # 32
    B, S = 2, 8
    alpha = 1.5           # entmax alpha (>1); 1.5 hits the transcendental-free path

    key = jax.random.PRNGKey(0)
    keys = jax.random.split(key, 8)
    bound = 1.0 / math.sqrt(D)

    def u(k, shape):
        return jax.random.uniform(k, shape, jnp.float32, -bound, bound)

    wq = u(keys[0], (D, D)); bq = u(keys[1], (1, D))
    w1 = u(keys[2], (D, D)); b1 = u(keys[3], (1, D))
    w2 = u(keys[4], (D, D)); b2 = u(keys[5], (1, D))
    gamma = jnp.ones((1, D), jnp.float32)
    beta = jnp.zeros((1, D), jnp.float32)
    params = (wq, bq, w1, b1, w2, b2, gamma, beta)

    x = jax.random.normal(keys[6], (B, S, D), jnp.float32)

    C, target_emb = s_att_forward(x, params, alpha, emb_size)
    jax.block_until_ready((C, target_emb))

    assert C.shape == (B, S - 1, D)
    assert target_emb.shape == (B, D)
    assert bool(jnp.all(jnp.isfinite(C))) and bool(jnp.all(jnp.isfinite(target_emb)))

    # correctness vs. pure-JAX reference (n_iter=50, un-fused math)
    C_ref, t_ref = _s_att_ref(x, params, alpha, emb_size)
    err = max(float(jnp.max(jnp.abs(C - C_ref))),
              float(jnp.max(jnp.abs(target_emb - t_ref))))
    assert err < 2e-3, f"mismatch vs reference: {err}"

    print("KERNEL_OK")
</pallas_src>

<mosaic_0001>
module attributes {stable_mosaic.version = 11 : i64} {
  func.func @kernel(%arg0: i32, %arg1: memref<2x8x32xf32, #tpu.memory_space<vmem>>, %arg2: memref<32x32xf32, #tpu.memory_space<vmem>>, %arg3: memref<1x32xf32, #tpu.memory_space<vmem>>, %arg4: memref<32x32xf32, #tpu.memory_space<vmem>>, %arg5: memref<1x32xf32, #tpu.memory_space<vmem>>, %arg6: memref<32x32xf32, #tpu.memory_space<vmem>>, %arg7: memref<1x32xf32, #tpu.memory_space<vmem>>, %arg8: memref<1x32xf32, #tpu.memory_space<vmem>>, %arg9: memref<1x32xf32, #tpu.memory_space<vmem>>, %arg10: memref<2x8x32xf32, #tpu.memory_space<vmem>>) attributes {dimension_semantics = [#tpu.dimension_semantics<parallel>], iteration_bounds = array<i64: 1>, scalar_prefetch = 0 : i64, scratch_operands = 0 : i64, tpu.core_type = #tpu.core_type<tc>, window_params = [{transform_indices = @transform_0, window_bounds = array<i64: 2, 8, 32>}, {pipeline_mode = #tpu.pipeline_mode<synchronous>, transform_indices = @transform_1, window_bounds = array<i64: 32, 32>}, {pipeline_mode = #tpu.pipeline_mode<synchronous>, transform_indices = @transform_2, window_bounds = array<i64: 1, 32>}, {pipeline_mode = #tpu.pipeline_mode<synchronous>, transform_indices = @transform_3, window_bounds = array<i64: 32, 32>}, {pipeline_mode = #tpu.pipeline_mode<synchronous>, transform_indices = @transform_4, window_bounds = array<i64: 1, 32>}, {pipeline_mode = #tpu.pipeline_mode<synchronous>, transform_indices = @transform_5, window_bounds = array<i64: 32, 32>}, {pipeline_mode = #tpu.pipeline_mode<synchronous>, transform_indices = @transform_6, window_bounds = array<i64: 1, 32>}, {pipeline_mode = #tpu.pipeline_mode<synchronous>, transform_indices = @transform_7, window_bounds = array<i64: 1, 32>}, {pipeline_mode = #tpu.pipeline_mode<synchronous>, transform_indices = @transform_8, window_bounds = array<i64: 1, 32>}, {transform_indices = @transform_9, window_bounds = array<i64: 2, 8, 32>}]} {
    %c0 = arith.constant 0 : index
    %c0_0 = arith.constant 0 : index
    %c0_1 = arith.constant 0 : index
    %0 = vector.load %arg1[%c0, %c0_0, %c0_1] : memref<2x8x32xf32, #tpu.memory_space<vmem>>, vector<2x8x32xf32>
    %1 = vector.shape_cast %0 : vector<2x8x32xf32> to vector<16x32xf32>
    %c0_2 = arith.constant 0 : index
    %c0_3 = arith.constant 0 : index
    %2 = vector.load %arg2[%c0_2, %c0_3] : memref<32x32xf32, #tpu.memory_space<vmem>>, vector<32x32xf32>
    %cst = arith.constant dense<0.000000e+00> : vector<16x32xf32>
    %3 = tpu.matmul %1, %2, %cst {dimension_numbers = #tpu.dot_dimension_numbers<[1], [0], [0], [1], [0, 0, 1, 1], [], []>} : vector<16x32xf32>, vector<32x32xf32>, vector<16x32xf32> -> vector<16x32xf32>
    %c0_4 = arith.constant 0 : index
    %c0_5 = arith.constant 0 : index
    %4 = vector.load %arg3[%c0_4, %c0_5] : memref<1x32xf32, #tpu.memory_space<vmem>>, vector<1x32xf32>
    %5 = vector.broadcast %4 : vector<1x32xf32> to vector<16x32xf32>
    %6 = arith.addf %3, %5 : vector<16x32xf32>
    %cst_6 = arith.constant 0.000000e+00 : f32
    %7 = vector.broadcast %cst_6 : f32 to vector<16x32xf32>
    %8 = arith.maximumf %6, %7 : vector<16x32xf32>
    %9 = vector.shape_cast %8 : vector<16x32xf32> to vector<2x8x32xf32>
    "tpu.trace_start"() <{level = 10 : i32, message = "bqd,bkd->bqk"}> : () -> ()
    %cst_7 = arith.constant dense<0.000000e+00> : vector<2x8x8xf32>
    %10 = tpu.matmul %9, %0, %cst_7 {dimension_numbers = #tpu.dot_dimension_numbers<[2], [2], [1], [1], [0, 0, 0, 1, 1, 1], [0], [0]>} : vector<2x8x32xf32>, vector<2x8x32xf32>, vector<2x8x8xf32> -> vector<2x8x8xf32>
    "tpu.trace_stop"() : () -> ()
    %cst_8 = arith.constant 0.0883883461 : f32
    %11 = vector.broadcast %cst_8 : f32 to vector<2x8x8xf32>
    %12 = arith.mulf %10, %11 : vector<2x8x8xf32>
    %cst_9 = arith.constant dense<0xFF800000> : vector<2x8xf32>
    %13 = vector.multi_reduction <maximumf>, %12, %cst_9 [2] : vector<2x8x8xf32> to vector<2x8xf32>
    %14 = vector.shape_cast %13 : vector<2x8xf32> to vector<2x8x1xf32>
    %cst_10 = arith.constant 1.000000e+00 : f32
    %15 = vector.broadcast %cst_10 : f32 to vector<2x8x1xf32>
    %16 = arith.subf %14, %15 : vector<2x8x1xf32>
    %17 = vector.broadcast %16 : vector<2x8x1xf32> to vector<2x8x8xf32>
    %18 = arith.subf %12, %17 : vector<2x8x8xf32>
    %cst_11 = arith.constant 0.000000e+00 : f32
    %19 = vector.broadcast %cst_11 : f32 to vector<2x8x8xf32>
    %20 = arith.maximumf %18, %19 : vector<2x8x8xf32>
    %21 = arith.mulf %20, %20 : vector<2x8x8xf32>
    %cst_12 = arith.constant dense<0.000000e+00> : vector<2x8xf32>
    %22 = vector.multi_reduction <add>, %21, %cst_12 [2] : vector<2x8x8xf32> to vector<2x8xf32>
    %23 = vector.shape_cast %22 : vector<2x8xf32> to vector<2x8x1xf32>
    %cst_13 = arith.constant 1.000000e+00 : f32
    %24 = vector.broadcast %cst_13 : f32 to vector<2x8x1xf32>
    %25 = arith.subf %23, %24 : vector<2x8x1xf32>
    %cst_14 = arith.constant 0.323223293 : f32
    %26 = vector.broadcast %cst_14 : f32 to vector<2x8x1xf32>
    %27 = arith.addf %16, %26 : vector<2x8x1xf32>
    %28 = vector.broadcast %27 : vector<2x8x1xf32> to vector<2x8x8xf32>
    %29 = arith.subf %12, %28 : vector<2x8x8xf32>
    %cst_15 = arith.constant 0.000000e+00 : f32
    %30 = vector.broadcast %cst_15 : f32 to vector<2x8x8xf32>
    %31 = arith.maximumf %29, %30 : vector<2x8x8xf32>
    %32 = arith.mulf %31, %31 : vector<2x8x8xf32>
    %cst_16 = arith.constant dense<0.000000e+00> : vector<2x8xf32>
    %33 = vector.multi_reduction <add>, %32, %cst_16 [2] : vector<2x8x8xf32> to vector<2x8xf32>
    %34 = vector.shape_cast %33 : vector<2x8xf32> to vector<2x8x1xf32>
    %cst_17 = arith.constant 1.000000e+00 : f32
    %35 = vector.broadcast %cst_17 : f32 to vector<2x8x1xf32>
    %36 = arith.subf %34, %35 : vector<2x8x1xf32>
    %37 = arith.mulf %36, %25 : vector<2x8x1xf32>
    %cst_18 = arith.constant 0.000000e+00 : f32
    %38 = vector.broadcast %cst_18 : f32 to vector<2x8x1xf32>
    %39 = arith.cmpf oge, %37, %38 : vector<2x8x1xf32>
    %40 = arith.select %39, %27, %16 : vector<2x8x1xi1>, vector<2x8x1xf32>
    %cst_19 = arith.constant 0.161611646 : f32
    %41 = vector.broadcast %cst_19 : f32 to vector<2x8x1xf32>
    %42 = arith.addf %40, %41 : vector<2x8x1xf32>
    %43 = vector.broadcast %42 : vector<2x8x1xf32> to vector<2x8x8xf32>
    %44 = arith.subf %12, %43 : vector<2x8x8xf32>
    %cst_20 = arith.constant 0.000000e+00 : f32
    %45 = vector.broadcast %cst_20 : f32 to vector<2x8x8xf32>
    %46 = arith.maximumf %44, %45 : vector<2x8x8xf32>
    %47 = arith.mulf %46, %46 : vector<2x8x8xf32>
    %cst_21 = arith.constant dense<0.000000e+00> : vector<2x8xf32>
    %48 = vector.multi_reduction <add>, %47, %cst_21 [2] : vector<2x8x8xf32> to vector<2x8xf32>
    %49 = vector.shape_cast %48 : vector<2x8xf32> to vector<2x8x1xf32>
    %cst_22 = arith.constant 1.000000e+00 : f32
    %50 = vector.broadcast %cst_22 : f32 to vector<2x8x1xf32>
    %51 = arith.subf %49, %50 : vector<2x8x1xf32>
    %52 = arith.mulf %51, %25 : vector<2x8x1xf32>
    %cst_23 = arith.constant 0.000000e+00 : f32
    %53 = vector.broadcast %cst_23 : f32 to vector<2x8x1xf32>
    %54 = arith.cmpf oge, %52, %53 : vector<2x8x1xf32>
    %55 = arith.select %54, %42, %40 : vector<2x8x1xi1>, vector<2x8x1xf32>
    %cst_24 = arith.constant 0.0808058232 : f32
    %56 = vector.broadcast %cst_24 : f32 to vector<2x8x1xf32>
    %57 = arith.addf %55, %56 : vector<2x8x1xf32>
    %58 = vector.broadcast %57 : vector<2x8x1xf32> to vector<2x8x8xf32>
    %59 = arith.subf %12, %58 : vector<2x8x8xf32>
    %cst_25 = arith.constant 0.000000e+00 : f32
    %60 = vector.broadcast %cst_25 : f32 to vector<2x8x8xf32>
    %61 = arith.maximumf %59, %60 : vector<2x8x8xf32>
    %62 = arith.mulf %61, %61 : vector<2x8x8xf32>
    %cst_26 = arith.constant dense<0.000000e+00> : vector<2x8xf32>
    %63 = vector.multi_reduction <add>, %62, %cst_26 [2] : vector<2x8x8xf32> to vector<2x8xf32>
    %64 = vector.shape_cast %63 : vector<2x8xf32> to vector<2x8x1xf32>
    %cst_27 = arith.constant 1.000000e+00 : f32
    %65 = vector.broadcast %cst_27 : f32 to vector<2x8x1xf32>
    %66 = arith.subf %64, %65 : vector<2x8x1xf32>
    %67 = arith.mulf %66, %25 : vector<2x8x1xf32>
    %cst_28 = arith.constant 0.000000e+00 : f32
    %68 = vector.broadcast %cst_28 : f32 to vector<2x8x1xf32>
    %69 = arith.cmpf oge, %67, %68 : vector<2x8x1xf32>
    %70 = arith.select %69, %57, %55 : vector<2x8x1xi1>, vector<2x8x1xf32>
    %cst_29 = arith.constant 0.0404029116 : f32
    %71 = vector.broadcast %cst_29 : f32 to vector<2x8x1xf32>
    %72 = arith.addf %70, %71 : vector<2x8x1xf32>
    %73 = vector.broadcast %72 : vector<2x8x1xf32> to vector<2x8x8xf32>
    %74 = arith.subf %12, %73 : vector<2x8x8xf32>
    %cst_30 = arith.constant 0.000000e+00 : f32
    %75 = vector.broadcast %cst_30 : f32 to vector<2x8x8xf32>
    %76 = arith.maximumf %74, %75 : vector<2x8x8xf32>
    %77 = arith.mulf %76, %76 : vector<2x8x8xf32>
    %cst_31 = arith.constant dense<0.000000e+00> : vector<2x8xf32>
    %78 = vector.multi_reduction <add>, %77, %cst_31 [2] : vector<2x8x8xf32> to vector<2x8xf32>
    %79 = vector.shape_cast %78 : vector<2x8xf32> to vector<2x8x1xf32>
    %cst_32 = arith.constant 1.000000e+00 : f32
    %80 = vector.broadcast %cst_32 : f32 to vector<2x8x1xf32>
    %81 = arith.subf %79, %80 : vector<2x8x1xf32>
    %82 = arith.mulf %81, %25 : vector<2x8x1xf32>
    %cst_33 = arith.constant 0.000000e+00 : f32
    %83 = vector.broadcast %cst_33 : f32 to vector<2x8x1xf32>
    %84 = arith.cmpf oge, %82, %83 : vector<2x8x1xf32>
    %85 = arith.select %84, %72, %70 : vector<2x8x1xi1>, vector<2x8x1xf32>
    %cst_34 = arith.constant 0.0202014558 : f32
    %86 = vector.broadcast %cst_34 : f32 to vector<2x8x1xf32>
    %87 = arith.addf %85, %86 : vector<2x8x1xf32>
    %88 = vector.broadcast %87 : vector<2x8x1xf32> to vector<2x8x8xf32>
    %89 = arith.subf %12, %88 : vector<2x8x8xf32>
    %cst_35 = arith.constant 0.000000e+00 : f32
    %90 = vector.broadcast %cst_35 : f32 to vector<2x8x8xf32>
    %91 = arith.maximumf %89, %90 : vector<2x8x8xf32>
    %92 = arith.mulf %91, %91 : vector<2x8x8xf32>
    %cst_36 = arith.constant dense<0.000000e+00> : vector<2x8xf32>
    %93 = vector.multi_reduction <add>, %92, %cst_36 [2] : vector<2x8x8xf32> to vector<2x8xf32>
    %94 = vector.shape_cast %93 : vector<2x8xf32> to vector<2x8x1xf32>
    %cst_37 = arith.constant 1.000000e+00 : f32
    %95 = vector.broadcast %cst_37 : f32 to vector<2x8x1xf32>
    %96 = arith.subf %94, %95 : vector<2x8x1xf32>
    %97 = arith.mulf %96, %25 : vector<2x8x1xf32>
    %cst_38 = arith.constant 0.000000e+00 : f32
    %98 = vector.broadcast %cst_38 : f32 to vector<2x8x1xf32>
    %99 = arith.cmpf oge, %97, %98 : vector<2x8x1xf32>
    %100 = arith.select %99, %87, %85 : vector<2x8x1xi1>, vector<2x8x1xf32>
    %cst_39 = arith.constant 0.0101007279 : f32
    %101 = vector.broadcast %cst_39 : f32 to vector<2x8x1xf32>
    %102 = arith.addf %100, %101 : vector<2x8x1xf32>
    %103 = vector.broadcast %102 : vector<2x8x1xf32> to vector<2x8x8xf32>
    %104 = arith.subf %12, %103 : vector<2x8x8xf32>
    %cst_40 = arith.constant 0.000000e+00 : f32
    %105 = vector.broadcast %cst_40 : f32 to vector<2x8x8xf32>
    %106 = arith.maximumf %104, %105 : vector<2x8x8xf32>
    %107 = arith.mulf %106, %106 : vector<2x8x8xf32>
    %cst_41 = arith.constant dense<0.000000e+00> : vector<2x8xf32>
    %108 = vector.multi_reduction <add>, %107, %cst_41 [2] : vector<2x8x8xf32> to vector<2x8xf32>
    %109 = vector.shape_cast %108 : vector<2x8xf32> to vector<2x8x1xf32>
    %cst_42 = arith.constant 1.000000e+00 : f32
    %110 = vector.broadcast %cst_42 : f32 to vector<2x8x1xf32>
    %111 = arith.subf %109, %110 : vector<2x8x1xf32>
    %112 = arith.mulf %111, %25 : vector<2x8x1xf32>
    %cst_43 = arith.constant 0.000000e+00 : f32
    %113 = vector.broadcast %cst_43 : f32 to vector<2x8x1xf32>
    %114 = arith.cmpf oge, %112, %113 : vector<2x8x1xf32>
    %115 = arith.select %114, %102, %100 : vector<2x8x1xi1>, vector<2x8x1xf32>
    %cst_44 = arith.constant 0.00505036395 : f32
    %116 = vector.broadcast %cst_44 : f32 to vector<2x8x1xf32>
    %117 = arith.addf %115, %116 : vector<2x8x1xf32>
    %118 = vector.broadcast %117 : vector<2x8x1xf32> to vector<2x8x8xf32>
    %119 = arith.subf %12, %118 : vector<2x8x8xf32>
    %cst_45 = arith.constant 0.000000e+00 : f32
    %120 = vector.broadcast %cst_45 : f32 to vector<2x8x8xf32>
    %121 = arith.maximumf %119, %120 : vector<2x8x8xf32>
    %122 = arith.mulf %121, %121 : vector<2x8x8xf32>
    %cst_46 = arith.constant dense<0.000000e+00> : vector<2x8xf32>
    %123 = vector.multi_reduction <add>, %122, %cst_46 [2] : vector<2x8x8xf32> to vector<2x8xf32>
    %124 = vector.shape_cast %123 : vector<2x8xf32> to vector<2x8x1xf32>
    %cst_47 = arith.constant 1.000000e+00 : f32
    %125 = vector.broadcast %cst_47 : f32 to vector<2x8x1xf32>
    %126 = arith.subf %124, %125 : vector<2x8x1xf32>
    %127 = arith.mulf %126, %25 : vector<2x8x1xf32>
    %cst_48 = arith.constant 0.000000e+00 : f32
    %128 = vector.broadcast %cst_48 : f32 to vector<2x8x1xf32>
    %129 = arith.cmpf oge, %127, %128 : vector<2x8x1xf32>
    %130 = arith.select %129, %117, %115 : vector<2x8x1xi1>, vector<2x8x1xf32>
    %cst_49 = arith.constant 0.00252518198 : f32
    %131 = vector.broadcast %cst_49 : f32 to vector<2x8x1xf32>
    %132 = arith.addf %130, %131 : vector<2x8x1xf32>
    %133 = vector.broadcast %132 : vector<2x8x1xf32> to vector<2x8x8xf32>
    %134 = arith.subf %12, %133 : vector<2x8x8xf32>
    %cst_50 = arith.constant 0.000000e+00 : f32
    %135 = vector.broadcast %cst_50 : f32 to vector<2x8x8xf32>
    %136 = arith.maximumf %134, %135 : vector<2x8x8xf32>
    %137 = arith.mulf %136, %136 : vector<2x8x8xf32>
    %cst_51 = arith.constant dense<0.000000e+00> : vector<2x8xf32>
    %138 = vector.multi_reduction <add>, %137, %cst_51 [2] : vector<2x8x8xf32> to vector<2x8xf32>
    %139 = vector.shape_cast %138 : vector<2x8xf32> to vector<2x8x1xf32>
    %cst_52 = arith.constant 1.000000e+00 : f32
    %140 = vector.broadcast %cst_52 : f32 to vector<2x8x1xf32>
    %141 = arith.subf %139, %140 : vector<2x8x1xf32>
    %142 = arith.mulf %141, %25 : vector<2x8x1xf32>
    %cst_53 = arith.constant 0.000000e+00 : f32
    %143 = vector.broadcast %cst_53 : f32 to vector<2x8x1xf32>
    %144 = arith.cmpf oge, %142, %143 : vector<2x8x1xf32>
    %145 = arith.select %144, %132, %130 : vector<2x8x1xi1>, vector<2x8x1xf32>
    %cst_54 = arith.constant 0.00126259099 : f32
    %146 = vector.broadcast %cst_54 : f32 to vector<2x8x1xf32>
    %147 = arith.addf %145, %146 : vector<2x8x1xf32>
    %148 = vector.broadcast %147 : vector<2x8x1xf32> to vector<2x8x8xf32>
    %149 = arith.subf %12, %148 : vector<2x8x8xf32>
    %cst_55 = arith.constant 0.000000e+00 : f32
    %150 = vector.broadcast %cst_55 : f32 to vector<2x8x8xf32>
    %151 = arith.maximumf %149, %150 : vector<2x8x8xf32>
    %152 = arith.mulf %151, %151 : vector<2x8x8xf32>
    %cst_56 = arith.constant dense<0.000000e+00> : vector<2x8xf32>
    %153 = vector.multi_reduction <add>, %152, %cst_56 [2] : vector<2x8x8xf32> to vector<2x8xf32>
    %154 = vector.shape_cast %153 : vector<2x8xf32> to vector<2x8x1xf32>
    %cst_57 = arith.constant 1.000000e+00 : f32
    %155 = vector.broadcast %cst_57 : f32 to vector<2x8x1xf32>
    %156 = arith.subf %154, %155 : vector<2x8x1xf32>
    %157 = arith.mulf %156, %25 : vector<2x8x1xf32>
    %cst_58 = arith.constant 0.000000e+00 : f32
    %158 = vector.broadcast %cst_58 : f32 to vector<2x8x1xf32>
    %159 = arith.cmpf oge, %157, %158 : vector<2x8x1xf32>
    %160 = arith.select %159, %147, %145 : vector<2x8x1xi1>, vector<2x8x1xf32>
    %cst_59 = arith.constant 6.31295494E-4 : f32
    %161 = vector.broadcast %cst_59 : f32 to vector<2x8x1xf32>
    %162 = arith.addf %160, %161 : vector<2x8x1xf32>
    %163 = vector.broadcast %162 : vector<2x8x1xf32> to vector<2x8x8xf32>
    %164 = arith.subf %12, %163 : vector<2x8x8xf32>
    %cst_60 = arith.constant 0.000000e+00 : f32
    %165 = vector.broadcast %cst_60 : f32 to vector<2x8x8xf32>
    %166 = arith.maximumf %164, %165 : vector<2x8x8xf32>
    %167 = arith.mulf %166, %166 : vector<2x8x8xf32>
    %cst_61 = arith.constant dense<0.000000e+00> : vector<2x8xf32>
    %168 = vector.multi_reduction <add>, %167, %cst_61 [2] : vector<2x8x8xf32> to vector<2x8xf32>
    %169 = vector.shape_cast %168 : vector<2x8xf32> to vector<2x8x1xf32>
    %cst_62 = arith.constant 1.000000e+00 : f32
    %170 = vector.broadcast %cst_62 : f32 to vector<2x8x1xf32>
    %171 = arith.subf %169, %170 : vector<2x8x1xf32>
    %172 = arith.mulf %171, %25 : vector<2x8x1xf32>
    %cst_63 = arith.constant 0.000000e+00 : f32
    %173 = vector.broadcast %cst_63 : f32 to vector<2x8x1xf32>
    %174 = arith.cmpf oge, %172, %173 : vector<2x8x1xf32>
    %175 = arith.select %174, %162, %160 : vector<2x8x1xi1>, vector<2x8x1xf32>
    %cst_64 = arith.constant 3.15647747E-4 : f32
    %176 = vector.broadcast %cst_64 : f32 to vector<2x8x1xf32>
    %177 = arith.addf %175, %176 : vector<2x8x1xf32>
    %178 = vector.broadcast %177 : vector<2x8x1xf32> to vector<2x8x8xf32>
    %179 = arith.subf %12, %178 : vector<2x8x8xf32>
    %cst_65 = arith.constant 0.000000e+00 : f32
    %180 = vector.broadcast %cst_65 : f32 to vector<2x8x8xf32>
    %181 = arith.maximumf %179, %180 : vector<2x8x8xf32>
    %182 = arith.mulf %181, %181 : vector<2x8x8xf32>
    %cst_66 = arith.constant dense<0.000000e+00> : vector<2x8xf32>
    %183 = vector.multi_reduction <add>, %182, %cst_66 [2] : vector<2x8x8xf32> to vector<2x8xf32>
    %184 = vector.shape_cast %183 : vector<2x8xf32> to vector<2x8x1xf32>
    %cst_67 = arith.constant 1.000000e+00 : f32
    %185 = vector.broadcast %cst_67 : f32 to vector<2x8x1xf32>
    %186 = arith.subf %184, %185 : vector<2x8x1xf32>
    %187 = arith.mulf %186, %25 : vector<2x8x1xf32>
    %cst_68 = arith.constant 0.000000e+00 : f32
    %188 = vector.broadcast %cst_68 : f32 to vector<2x8x1xf32>
    %189 = arith.cmpf oge, %187, %188 : vector<2x8x1xf32>
    %190 = arith.select %189, %177, %175 : vector<2x8x1xi1>, vector<2x8x1xf32>
    %cst_69 = arith.constant 1.57823873E-4 : f32
    %191 = vector.broadcast %cst_69 : f32 to vector<2x8x1xf32>
    %192 = arith.addf %190, %191 : vector<2x8x1xf32>
    %193 = vector.broadcast %192 : vector<2x8x1xf32> to vector<2x8x8xf32>
    %194 = arith.subf %12, %193 : vector<2x8x8xf32>
    %cst_70 = arith.constant 0.000000e+00 : f32
    %195 = vector.broadcast %cst_70 : f32 to vector<2x8x8xf32>
    %196 = arith.maximumf %194, %195 : vector<2x8x8xf32>
    %197 = arith.mulf %196, %196 : vector<2x8x8xf32>
    %cst_71 = arith.constant dense<0.000000e+00> : vector<2x8xf32>
    %198 = vector.multi_reduction <add>, %197, %cst_71 [2] : vector<2x8x8xf32> to vector<2x8xf32>
    %199 = vector.shape_cast %198 : vector<2x8xf32> to vector<2x8x1xf32>
    %cst_72 = arith.constant 1.000000e+00 : f32
    %200 = vector.broadcast %cst_72 : f32 to vector<2x8x1xf32>
    %201 = arith.subf %199, %200 : vector<2x8x1xf32>
    %202 = arith.mulf %201, %25 : vector<2x8x1xf32>
    %cst_73 = arith.constant 0.000000e+00 : f32
    %203 = vector.broadcast %cst_73 : f32 to vector<2x8x1xf32>
    %204 = arith.cmpf oge, %202, %203 : vector<2x8x1xf32>
    %205 = arith.select %204, %192, %190 : vector<2x8x1xi1>, vector<2x8x1xf32>
    %cst_74 = arith.constant 7.89119367E-5 : f32
    %206 = vector.broadcast %cst_74 : f32 to vector<2x8x1xf32>
    %207 = arith.addf %205, %206 : vector<2x8x1xf32>
    %208 = vector.broadcast %207 : vector<2x8x1xf32> to vector<2x8x8xf32>
    %209 = arith.subf %12, %208 : vector<2x8x8xf32>
    %cst_75 = arith.constant 0.000000e+00 : f32
    %210 = vector.broadcast %cst_75 : f32 to vector<2x8x8xf32>
    %211 = arith.maximumf %209, %210 : vector<2x8x8xf32>
    %212 = arith.mulf %211, %211 : vector<2x8x8xf32>
    %cst_76 = arith.constant dense<0.000000e+00> : vector<2x8xf32>
    %213 = vector.multi_reduction <add>, %212, %cst_76 [2] : vector<2x8x8xf32> to vector<2x8xf32>
    %214 = vector.shape_cast %213 : vector<2x8xf32> to vector<2x8x1xf32>
    %cst_77 = arith.constant 1.000000e+00 : f32
    %215 = vector.broadcast %cst_77 : f32 to vector<2x8x1xf32>
    %216 = arith.subf %214, %215 : vector<2x8x1xf32>
    %217 = arith.mulf %216, %25 : vector<2x8x1xf32>
    %cst_78 = arith.constant 0.000000e+00 : f32
    %218 = vector.broadcast %cst_78 : f32 to vector<2x8x1xf32>
    %219 = arith.cmpf oge, %217, %218 : vector<2x8x1xf32>
    %220 = arith.select %219, %207, %205 : vector<2x8x1xi1>, vector<2x8x1xf32>
    %cst_79 = arith.constant 3.94559684E-5 : f32
    %221 = vector.broadcast %cst_79 : f32 to vector<2x8x1xf32>
    %222 = arith.addf %220, %221 : vector<2x8x1xf32>
    %223 = vector.broadcast %222 : vector<2x8x1xf32> to vector<2x8x8xf32>
    %224 = arith.subf %12, %223 : vector<2x8x8xf32>
    %cst_80 = arith.constant 0.000000e+00 : f32
    %225 = vector.broadcast %cst_80 : f32 to vector<2x8x8xf32>
    %226 = arith.maximumf %224, %225 : vector<2x8x8xf32>
    %227 = arith.mulf %226, %226 : vector<2x8x8xf32>
    %cst_81 = arith.constant dense<0.000000e+00> : vector<2x8xf32>
    %228 = vector.multi_reduction <add>, %227, %cst_81 [2] : vector<2x8x8xf32> to vector<2x8xf32>
    %229 = vector.shape_cast %228 : vector<2x8xf32> to vector<2x8x1xf32>
    %cst_82 = arith.constant 1.000000e+00 : f32
    %230 = vector.broadcast %cst_82 : f32 to vector<2x8x1xf32>
    %231 = arith.subf %229, %230 : vector<2x8x1xf32>
    %232 = arith.mulf %231, %25 : vector<2x8x1xf32>
    %cst_83 = arith.constant 0.000000e+00 : f32
    %233 = vector.broadcast %cst_83 : f32 to vector<2x8x1xf32>
    %234 = arith.cmpf oge, %232, %233 : vector<2x8x1xf32>
    %235 = arith.select %234, %222, %220 : vector<2x8x1xi1>, vector<2x8x1xf32>
    %cst_84 = arith.constant 1.97279842E-5 : f32
    %236 = vector.broadcast %cst_84 : f32 to vector<2x8x1xf32>
    %237 = arith.addf %235, %236 : vector<2x8x1xf32>
    %238 = vector.broadcast %237 : vector<2x8x1xf32> to vector<2x8x8xf32>
    %239 = arith.subf %12, %238 : vector<2x8x8xf32>
    %cst_85 = arith.constant 0.000000e+00 : f32
    %240 = vector.broadcast %cst_85 : f32 to vector<2x8x8xf32>
    %241 = arith.maximumf %239, %240 : vector<2x8x8xf32>
    %242 = arith.mulf %241, %241 : vector<2x8x8xf32>
    %cst_86 = arith.constant dense<0.000000e+00> : vector<2x8xf32>
    %243 = vector.multi_reduction <add>, %242, %cst_86 [2] : vector<2x8x8xf32> to vector<2x8xf32>
    %244 = vector.shape_cast %243 : vector<2x8xf32> to vector<2x8x1xf32>
    %cst_87 = arith.constant 1.000000e+00 : f32
    %245 = vector.broadcast %cst_87 : f32 to vector<2x8x1xf32>
    %246 = arith.subf %244, %245 : vector<2x8x1xf32>
    %247 = arith.mulf %246, %25 : vector<2x8x1xf32>
    %cst_88 = arith.constant 0.000000e+00 : f32
    %248 = vector.broadcast %cst_88 : f32 to vector<2x8x1xf32>
    %249 = arith.cmpf oge, %247, %248 : vector<2x8x1xf32>
    %250 = arith.select %249, %237, %235 : vector<2x8x1xi1>, vector<2x8x1xf32>
    %cst_89 = arith.constant 9.86399209E-6 : f32
    %251 = vector.broadcast %cst_89 : f32 to vector<2x8x1xf32>
    %252 = arith.addf %250, %251 : vector<2x8x1xf32>
    %253 = vector.broadcast %252 : vector<2x8x1xf32> to vector<2x8x8xf32>
    %254 = arith.subf %12, %253 : vector<2x8x8xf32>
    %cst_90 = arith.constant 0.000000e+00 : f32
    %255 = vector.broadcast %cst_90 : f32 to vector<2x8x8xf32>
    %256 = arith.maximumf %254, %255 : vector<2x8x8xf32>
    %257 = arith.mulf %256, %256 : vector<2x8x8xf32>
    %cst_91 = arith.constant dense<0.000000e+00> : vector<2x8xf32>
    %258 = vector.multi_reduction <add>, %257, %cst_91 [2] : vector<2x8x8xf32> to vector<2x8xf32>
    %259 = vector.shape_cast %258 : vector<2x8xf32> to vector<2x8x1xf32>
    %cst_92 = arith.constant 1.000000e+00 : f32
    %260 = vector.broadcast %cst_92 : f32 to vector<2x8x1xf32>
    %261 = arith.subf %259, %260 : vector<2x8x1xf32>
    %262 = arith.mulf %261, %25 : vector<2x8x1xf32>
    %cst_93 = arith.constant 0.000000e+00 : f32
    %263 = vector.broadcast %cst_93 : f32 to vector<2x8x1xf32>
    %264 = arith.cmpf oge, %262, %263 : vector<2x8x1xf32>
    %265 = arith.select %264, %252, %250 : vector<2x8x1xi1>, vector<2x8x1xf32>
    %cst_94 = arith.constant 4.93199605E-6 : f32
    %266 = vector.broadcast %cst_94 : f32 to vector<2x8x1xf32>
    %267 = arith.addf %265, %266 : vector<2x8x1xf32>
    %268 = vector.broadcast %267 : vector<2x8x1xf32> to vector<2x8x8xf32>
    %269 = arith.subf %12, %268 : vector<2x8x8xf32>
    %cst_95 = arith.constant 0.000000e+00 : f32
    %270 = vector.broadcast %cst_95 : f32 to vector<2x8x8xf32>
    %271 = arith.maximumf %269, %270 : vector<2x8x8xf32>
    %272 = arith.mulf %271, %271 : vector<2x8x8xf32>
    %cst_96 = arith.constant dense<0.000000e+00> : vector<2x8xf32>
    %273 = vector.multi_reduction <add>, %272, %cst_96 [2] : vector<2x8x8xf32> to vector<2x8xf32>
    %274 = vector.shape_cast %273 : vector<2x8xf32> to vector<2x8x1xf32>
    %cst_97 = arith.constant 1.000000e+00 : f32
    %275 = vector.broadcast %cst_97 : f32 to vector<2x8x1xf32>
    %276 = arith.subf %274, %275 : vector<2x8x1xf32>
    %277 = arith.mulf %276, %25 : vector<2x8x1xf32>
    %cst_98 = arith.constant 0.000000e+00 : f32
    %278 = vector.broadcast %cst_98 : f32 to vector<2x8x1xf32>
    %279 = arith.cmpf oge, %277, %278 : vector<2x8x1xf32>
    %280 = arith.select %279, %267, %265 : vector<2x8x1xi1>, vector<2x8x1xf32>
    %cst_99 = arith.constant 2.46599802E-6 : f32
    %281 = vector.broadcast %cst_99 : f32 to vector<2x8x1xf32>
    %282 = arith.addf %280, %281 : vector<2x8x1xf32>
    %283 = vector.broadcast %282 : vector<2x8x1xf32> to vector<2x8x8xf32>
    %284 = arith.subf %12, %283 : vector<2x8x8xf32>
    %cst_100 = arith.constant 0.000000e+00 : f32
    %285 = vector.broadcast %cst_100 : f32 to vector<2x8x8xf32>
    %286 = arith.maximumf %284, %285 : vector<2x8x8xf32>
    %287 = arith.mulf %286, %286 : vector<2x8x8xf32>
    %cst_101 = arith.constant dense<0.000000e+00> : vector<2x8xf32>
    %288 = vector.multi_reduction <add>, %287, %cst_101 [2] : vector<2x8x8xf32> to vector<2x8xf32>
    %289 = vector.shape_cast %288 : vector<2x8xf32> to vector<2x8x1xf32>
    %cst_102 = arith.constant 1.000000e+00 : f32
    %290 = vector.broadcast %cst_102 : f32 to vector<2x8x1xf32>
    %291 = arith.subf %289, %290 : vector<2x8x1xf32>
    %292 = arith.mulf %291, %25 : vector<2x8x1xf32>
    %cst_103 = arith.constant 0.000000e+00 : f32
    %293 = vector.broadcast %cst_103 : f32 to vector<2x8x1xf32>
    %294 = arith.cmpf oge, %292, %293 : vector<2x8x1xf32>
    %295 = arith.select %294, %282, %280 : vector<2x8x1xi1>, vector<2x8x1xf32>
    %cst_104 = arith.constant 1.23299901E-6 : f32
    %296 = vector.broadcast %cst_104 : f32 to vector<2x8x1xf32>
    %297 = arith.addf %295, %296 : vector<2x8x1xf32>
    %298 = vector.broadcast %297 : vector<2x8x1xf32> to vector<2x8x8xf32>
    %299 = arith.subf %12, %298 : vector<2x8x8xf32>
    %cst_105 = arith.constant 0.000000e+00 : f32
    %300 = vector.broadcast %cst_105 : f32 to vector<2x8x8xf32>
    %301 = arith.maximumf %299, %300 : vector<2x8x8xf32>
    %302 = arith.mulf %301, %301 : vector<2x8x8xf32>
    %cst_106 = arith.constant dense<0.000000e+00> : vector<2x8xf32>
    %303 = vector.multi_reduction <add>, %302, %cst_106 [2] : vector<2x8x8xf32> to vector<2x8xf32>
    %304 = vector.shape_cast %303 : vector<2x8xf32> to vector<2x8x1xf32>
    %cst_107 = arith.constant 1.000000e+00 : f32
    %305 = vector.broadcast %cst_107 : f32 to vector<2x8x1xf32>
    %306 = arith.subf %304, %305 : vector<2x8x1xf32>
    %307 = arith.mulf %306, %25 : vector<2x8x1xf32>
    %cst_108 = arith.constant 0.000000e+00 : f32
    %308 = vector.broadcast %cst_108 : f32 to vector<2x8x1xf32>
    %309 = arith.cmpf oge, %307, %308 : vector<2x8x1xf32>
    %310 = arith.select %309, %297, %295 : vector<2x8x1xi1>, vector<2x8x1xf32>
    %cst_109 = arith.constant 6.16499506E-7 : f32
    %311 = vector.broadcast %cst_109 : f32 to vector<2x8x1xf32>
    %312 = arith.addf %310, %311 : vector<2x8x1xf32>
    %313 = vector.broadcast %312 : vector<2x8x1xf32> to vector<2x8x8xf32>
    %314 = arith.subf %12, %313 : vector<2x8x8xf32>
    %cst_110 = arith.constant 0.000000e+00 : f32
    %315 = vector.broadcast %cst_110 : f32 to vector<2x8x8xf32>
    %316 = arith.maximumf %314, %315 : vector<2x8x8xf32>
    %317 = arith.mulf %316, %316 : vector<2x8x8xf32>
    %cst_111 = arith.constant dense<0.000000e+00> : vector<2x8xf32>
    %318 = vector.multi_reduction <add>, %317, %cst_111 [2] : vector<2x8x8xf32> to vector<2x8xf32>
    %319 = vector.shape_cast %318 : vector<2x8xf32> to vector<2x8x1xf32>
    %cst_112 = arith.constant 1.000000e+00 : f32
    %320 = vector.broadcast %cst_112 : f32 to vector<2x8x1xf32>
    %321 = arith.subf %319, %320 : vector<2x8x1xf32>
    %322 = arith.mulf %321, %25 : vector<2x8x1xf32>
    %cst_113 = arith.constant 0.000000e+00 : f32
    %323 = vector.broadcast %cst_113 : f32 to vector<2x8x1xf32>
    %324 = arith.cmpf oge, %322, %323 : vector<2x8x1xf32>
    %325 = arith.select %324, %312, %310 : vector<2x8x1xi1>, vector<2x8x1xf32>
    %cst_114 = arith.constant 3.08249753E-7 : f32
    %326 = vector.broadcast %cst_114 : f32 to vector<2x8x1xf32>
    %327 = arith.addf %325, %326 : vector<2x8x1xf32>
    %328 = vector.broadcast %327 : vector<2x8x1xf32> to vector<2x8x8xf32>
    %329 = arith.subf %12, %328 : vector<2x8x8xf32>
    %cst_115 = arith.constant 0.000000e+00 : f32
    %330 = vector.broadcast %cst_115 : f32 to vector<2x8x8xf32>
    %331 = arith.maximumf %329, %330 : vector<2x8x8xf32>
    %332 = arith.mulf %331, %331 : vector<2x8x8xf32>
    %cst_116 = arith.constant dense<0.000000e+00> : vector<2x8xf32>
    %333 = vector.multi_reduction <add>, %332, %cst_116 [2] : vector<2x8x8xf32> to vector<2x8xf32>
    %334 = vector.shape_cast %333 : vector<2x8xf32> to vector<2x8x1xf32>
    %cst_117 = arith.constant 1.000000e+00 : f32
    %335 = vector.broadcast %cst_117 : f32 to vector<2x8x1xf32>
    %336 = arith.subf %334, %335 : vector<2x8x1xf32>
    %337 = arith.mulf %336, %25 : vector<2x8x1xf32>
    %cst_118 = arith.constant 0.000000e+00 : f32
    %338 = vector.broadcast %cst_118 : f32 to vector<2x8x1xf32>
    %339 = arith.cmpf oge, %337, %338 : vector<2x8x1xf32>
    %340 = arith.select %339, %327, %325 : vector<2x8x1xi1>, vector<2x8x1xf32>
    %cst_119 = arith.constant 1.54124876E-7 : f32
    %341 = vector.broadcast %cst_119 : f32 to vector<2x8x1xf32>
    %342 = arith.addf %340, %341 : vector<2x8x1xf32>
    %343 = vector.broadcast %342 : vector<2x8x1xf32> to vector<2x8x8xf32>
    %344 = arith.subf %12, %343 : vector<2x8x8xf32>
    %cst_120 = arith.constant 0.000000e+00 : f32
    %345 = vector.broadcast %cst_120 : f32 to vector<2x8x8xf32>
    %346 = arith.maximumf %344, %345 : vector<2x8x8xf32>
    %347 = arith.mulf %346, %346 : vector<2x8x8xf32>
    %cst_121 = arith.constant dense<0.000000e+00> : vector<2x8xf32>
    %348 = vector.multi_reduction <add>, %347, %cst_121 [2] : vector<2x8x8xf32> to vector<2x8xf32>
    %349 = vector.shape_cast %348 : vector<2x8xf32> to vector<2x8x1xf32>
    %cst_122 = arith.constant 1.000000e+00 : f32
    %350 = vector.broadcast %cst_122 : f32 to vector<2x8x1xf32>
    %351 = arith.subf %349, %350 : vector<2x8x1xf32>
    %352 = arith.mulf %351, %25 : vector<2x8x1xf32>
    %cst_123 = arith.constant 0.000000e+00 : f32
    %353 = vector.broadcast %cst_123 : f32 to vector<2x8x1xf32>
    %354 = arith.cmpf oge, %352, %353 : vector<2x8x1xf32>
    %355 = arith.select %354, %342, %340 : vector<2x8x1xi1>, vector<2x8x1xf32>
    %cst_124 = arith.constant 7.70624382E-8 : f32
    %356 = vector.broadcast %cst_124 : f32 to vector<2x8x1xf32>
    %357 = arith.addf %355, %356 : vector<2x8x1xf32>
    %358 = vector.broadcast %357 : vector<2x8x1xf32> to vector<2x8x8xf32>
    %359 = arith.subf %12, %358 : vector<2x8x8xf32>
    %cst_125 = arith.constant 0.000000e+00 : f32
    %360 = vector.broadcast %cst_125 : f32 to vector<2x8x8xf32>
    %361 = arith.maximumf %359, %360 : vector<2x8x8xf32>
    %362 = arith.mulf %361, %361 : vector<2x8x8xf32>
    %cst_126 = arith.constant dense<0.000000e+00> : vector<2x8xf32>
    %363 = vector.multi_reduction <add>, %362, %cst_126 [2] : vector<2x8x8xf32> to vector<2x8xf32>
    %364 = vector.shape_cast %363 : vector<2x8xf32> to vector<2x8x1xf32>
    %cst_127 = arith.constant 1.000000e+00 : f32
    %365 = vector.broadcast %cst_127 : f32 to vector<2x8x1xf32>
    %366 = arith.subf %364, %365 : vector<2x8x1xf32>
    %367 = arith.mulf %366, %25 : vector<2x8x1xf32>
    %cst_128 = arith.constant 0.000000e+00 : f32
    %368 = vector.broadcast %cst_128 : f32 to vector<2x8x1xf32>
    %369 = arith.cmpf oge, %367, %368 : vector<2x8x1xf32>
    %370 = arith.select %369, %357, %355 : vector<2x8x1xi1>, vector<2x8x1xf32>
    %cst_129 = arith.constant 3.85312191E-8 : f32
    %371 = vector.broadcast %cst_129 : f32 to vector<2x8x1xf32>
    %372 = arith.addf %370, %371 : vector<2x8x1xf32>
    %373 = vector.broadcast %372 : vector<2x8x1xf32> to vector<2x8x8xf32>
    %374 = arith.subf %12, %373 : vector<2x8x8xf32>
    %cst_130 = arith.constant 0.000000e+00 : f32
    %375 = vector.broadcast %cst_130 : f32 to vector<2x8x8xf32>
    %376 = arith.maximumf %374, %375 : vector<2x8x8xf32>
    %377 = arith.mulf %376, %376 : vector<2x8x8xf32>
    %cst_131 = arith.constant dense<0.000000e+00> : vector<2x8xf32>
    %378 = vector.multi_reduction <add>, %377, %cst_131 [2] : vector<2x8x8xf32> to vector<2x8xf32>
    %379 = vector.shape_cast %378 : vector<2x8xf32> to vector<2x8x1xf32>
    %cst_132 = arith.constant 1.000000e+00 : f32
    %380 = vector.broadcast %cst_132 : f32 to vector<2x8x1xf32>
    %381 = arith.subf %379, %380 : vector<2x8x1xf32>
    %382 = arith.mulf %381, %25 : vector<2x8x1xf32>
    %cst_133 = arith.constant 0.000000e+00 : f32
    %383 = vector.broadcast %cst_133 : f32 to vector<2x8x1xf32>
    %384 = arith.cmpf oge, %382, %383 : vector<2x8x1xf32>
    %385 = arith.select %384, %372, %370 : vector<2x8x1xi1>, vector<2x8x1xf32>
    %cst_134 = arith.constant 1.92656096E-8 : f32
    %386 = vector.broadcast %cst_134 : f32 to vector<2x8x1xf32>
    %387 = arith.addf %385, %386 : vector<2x8x1xf32>
    %388 = vector.broadcast %387 : vector<2x8x1xf32> to vector<2x8x8xf32>
    %389 = arith.subf %12, %388 : vector<2x8x8xf32>
    %cst_135 = arith.constant 0.000000e+00 : f32
    %390 = vector.broadcast %cst_135 : f32 to vector<2x8x8xf32>
    %391 = arith.maximumf %389, %390 : vector<2x8x8xf32>
    %392 = arith.mulf %391, %391 : vector<2x8x8xf32>
    %cst_136 = arith.constant dense<0.000000e+00> : vector<2x8xf32>
    %393 = vector.multi_reduction <add>, %392, %cst_136 [2] : vector<2x8x8xf32> to vector<2x8xf32>
    %394 = vector.shape_cast %393 : vector<2x8xf32> to vector<2x8x1xf32>
    %cst_137 = arith.constant 1.000000e+00 : f32
    %395 = vector.broadcast %cst_137 : f32 to vector<2x8x1xf32>
    %396 = arith.subf %394, %395 : vector<2x8x1xf32>
    %397 = arith.mulf %396, %25 : vector<2x8x1xf32>
    %cst_138 = arith.constant 0.000000e+00 : f32
    %398 = vector.broadcast %cst_138 : f32 to vector<2x8x1xf32>
    %399 = arith.cmpf oge, %397, %398 : vector<2x8x1xf32>
    %400 = arith.select %399, %387, %385 : vector<2x8x1xi1>, vector<2x8x1xf32>
    %cst_139 = arith.constant 9.63280477E-9 : f32
    %401 = vector.broadcast %cst_139 : f32 to vector<2x8x1xf32>
    %402 = arith.addf %400, %401 : vector<2x8x1xf32>
    %403 = vector.broadcast %402 : vector<2x8x1xf32> to vector<2x8x8xf32>
    %404 = arith.subf %12, %403 : vector<2x8x8xf32>
    %cst_140 = arith.constant 0.000000e+00 : f32
    %405 = vector.broadcast %cst_140 : f32 to vector<2x8x8xf32>
    %406 = arith.maximumf %404, %405 : vector<2x8x8xf32>
    %407 = arith.mulf %406, %406 : vector<2x8x8xf32>
    %cst_141 = arith.constant dense<0.000000e+00> : vector<2x8xf32>
    %408 = vector.multi_reduction <add>, %407, %cst_141 [2] : vector<2x8x8xf32> to vector<2x8xf32>
    %409 = vector.shape_cast %408 : vector<2x8xf32> to vector<2x8x1xf32>
    %cst_142 = arith.constant 1.000000e+00 : f32
    %410 = vector.broadcast %cst_142 : f32 to vector<2x8x1xf32>
    %411 = arith.subf %409, %410 : vector<2x8x1xf32>
    %412 = arith.mulf %411, %25 : vector<2x8x1xf32>
    %cst_143 = arith.constant 0.000000e+00 : f32
    %413 = vector.broadcast %cst_143 : f32 to vector<2x8x1xf32>
    %414 = arith.cmpf oge, %412, %413 : vector<2x8x1xf32>
    %415 = arith.select %414, %402, %400 : vector<2x8x1xi1>, vector<2x8x1xf32>
    %cst_144 = arith.constant 4.81640239E-9 : f32
    %416 = vector.broadcast %cst_144 : f32 to vector<2x8x1xf32>
    %417 = arith.addf %415, %416 : vector<2x8x1xf32>
    %418 = vector.broadcast %417 : vector<2x8x1xf32> to vector<2x8x8xf32>
    %419 = arith.subf %12, %418 : vector<2x8x8xf32>
    %cst_145 = arith.constant 0.000000e+00 : f32
    %420 = vector.broadcast %cst_145 : f32 to vector<2x8x8xf32>
    %421 = arith.maximumf %419, %420 : vector<2x8x8xf32>
    %422 = arith.mulf %421, %421 : vector<2x8x8xf32>
    %cst_146 = arith.constant dense<0.000000e+00> : vector<2x8xf32>
    %423 = vector.multi_reduction <add>, %422, %cst_146 [2] : vector<2x8x8xf32> to vector<2x8xf32>
    %424 = vector.shape_cast %423 : vector<2x8xf32> to vector<2x8x1xf32>
    %cst_147 = arith.constant 1.000000e+00 : f32
    %425 = vector.broadcast %cst_147 : f32 to vector<2x8x1xf32>
    %426 = arith.subf %424, %425 : vector<2x8x1xf32>
    %427 = arith.mulf %426, %25 : vector<2x8x1xf32>
    %cst_148 = arith.constant 0.000000e+00 : f32
    %428 = vector.broadcast %cst_148 : f32 to vector<2x8x1xf32>
    %429 = arith.cmpf oge, %427, %428 : vector<2x8x1xf32>
    %430 = arith.select %429, %417, %415 : vector<2x8x1xi1>, vector<2x8x1xf32>
    %cst_149 = arith.constant 2.40820119E-9 : f32
    %431 = vector.broadcast %cst_149 : f32 to vector<2x8x1xf32>
    %432 = arith.addf %430, %431 : vector<2x8x1xf32>
    %433 = vector.broadcast %432 : vector<2x8x1xf32> to vector<2x8x8xf32>
    %434 = arith.subf %12, %433 : vector<2x8x8xf32>
    %cst_150 = arith.constant 0.000000e+00 : f32
    %435 = vector.broadcast %cst_150 : f32 to vector<2x8x8xf32>
    %436 = arith.maximumf %434, %435 : vector<2x8x8xf32>
    %437 = arith.mulf %436, %436 : vector<2x8x8xf32>
    %cst_151 = arith.constant dense<0.000000e+00> : vector<2x8xf32>
    %438 = vector.multi_reduction <add>, %437, %cst_151 [2] : vector<2x8x8xf32> to vector<2x8xf32>
    %439 = vector.shape_cast %438 : vector<2x8xf32> to vector<2x8x1xf32>
    %cst_152 = arith.constant 1.000000e+00 : f32
    %440 = vector.broadcast %cst_152 : f32 to vector<2x8x1xf32>
    %441 = arith.subf %439, %440 : vector<2x8x1xf32>
    %442 = arith.mulf %441, %25 : vector<2x8x1xf32>
    %cst_153 = arith.constant 0.000000e+00 : f32
    %443 = vector.broadcast %cst_153 : f32 to vector<2x8x1xf32>
    %444 = arith.cmpf oge, %442, %443 : vector<2x8x1xf32>
    %445 = arith.select %444, %432, %430 : vector<2x8x1xi1>, vector<2x8x1xf32>
    %cst_154 = arith.constant 1.2041006E-9 : f32
    %446 = vector.broadcast %cst_154 : f32 to vector<2x8x1xf32>
    %447 = arith.addf %445, %446 : vector<2x8x1xf32>
    %448 = vector.broadcast %447 : vector<2x8x1xf32> to vector<2x8x8xf32>
    %449 = arith.subf %12, %448 : vector<2x8x8xf32>
    %cst_155 = arith.constant 0.000000e+00 : f32
    %450 = vector.broadcast %cst_155 : f32 to vector<2x8x8xf32>
    %451 = arith.maximumf %449, %450 : vector<2x8x8xf32>
    %452 = arith.mulf %451, %451 : vector<2x8x8xf32>
    %cst_156 = arith.constant dense<0.000000e+00> : vector<2x8xf32>
    %453 = vector.multi_reduction <add>, %452, %cst_156 [2] : vector<2x8x8xf32> to vector<2x8xf32>
    %454 = vector.shape_cast %453 : vector<2x8xf32> to vector<2x8x1xf32>
    %cst_157 = arith.constant 1.000000e+00 : f32
    %455 = vector.broadcast %cst_157 : f32 to vector<2x8x1xf32>
    %456 = arith.subf %454, %455 : vector<2x8x1xf32>
    %457 = arith.mulf %456, %25 : vector<2x8x1xf32>
    %cst_158 = arith.constant 0.000000e+00 : f32
    %458 = vector.broadcast %cst_158 : f32 to vector<2x8x1xf32>
    %459 = arith.cmpf oge, %457, %458 : vector<2x8x1xf32>
    %460 = arith.select %459, %447, %445 : vector<2x8x1xi1>, vector<2x8x1xf32>
    %cst_159 = arith.constant 6.02050299E-10 : f32
    %461 = vector.broadcast %cst_159 : f32 to vector<2x8x1xf32>
    %462 = arith.addf %460, %461 : vector<2x8x1xf32>
    %463 = vector.broadcast %462 : vector<2x8x1xf32> to vector<2x8x8xf32>
    %464 = arith.subf %12, %463 : vector<2x8x8xf32>
    %cst_160 = arith.constant 0.000000e+00 : f32
    %465 = vector.broadcast %cst_160 : f32 to vector<2x8x8xf32>
    %466 = arith.maximumf %464, %465 : vector<2x8x8xf32>
    %467 = arith.mulf %466, %466 : vector<2x8x8xf32>
    %cst_161 = arith.constant dense<0.000000e+00> : vector<2x8xf32>
    %468 = vector.multi_reduction <add>, %467, %cst_161 [2] : vector<2x8x8xf32> to vector<2x8xf32>
    %469 = vector.shape_cast %468 : vector<2x8xf32> to vector<2x8x1xf32>
    %470 = vector.broadcast %469 : vector<2x8x1xf32> to vector<2x8x8xf32>
    %471 = arith.divf %467, %470 : vector<2x8x8xf32>
    "tpu.trace_start"() <{level = 10 : i32, message = "bqk,bkd->bqd"}> : () -> ()
    %cst_162 = arith.constant dense<0.000000e+00> : vector<2x8x32xf32>
    %472 = tpu.matmul %471, %0, %cst_162 {dimension_numbers = #tpu.dot_dimension_numbers<[2], [1], [1], [2], [0, 0, 0, 1, 1, 2], [0], [0]>} : vector<2x8x8xf32>, vector<2x8x32xf32>, vector<2x8x32xf32> -> vector<2x8x32xf32>
    "tpu.trace_stop"() : () -> ()
    %473 = vector.shape_cast %472 : vector<2x8x32xf32> to vector<16x32xf32>
    %c0_163 = arith.constant 0 : index
    %c0_164 = arith.constant 0 : index
    %474 = vector.load %arg4[%c0_163, %c0_164] : memref<32x32xf32, #tpu.memory_space<vmem>>, vector<32x32xf32>
    %cst_165 = arith.constant dense<0.000000e+00> : vector<16x32xf32>
    %475 = tpu.matmul %473, %474, %cst_165 {dimension_numbers = #tpu.dot_dimension_numbers<[1], [0], [0], [1], [0, 0, 1, 1], [], []>} : vector<16x32xf32>, vector<32x32xf32>, vector<16x32xf32> -> vector<16x32xf32>
    %c0_166 = arith.constant 0 : index
    %c0_167 = arith.constant 0 : index
    %476 = vector.load %arg5[%c0_166, %c0_167] : memref<1x32xf32, #tpu.memory_space<vmem>>, vector<1x32xf32>
    %477 = vector.broadcast %476 : vector<1x32xf32> to vector<16x32xf32>
    %478 = arith.addf %475, %477 : vector<16x32xf32>
    %cst_168 = arith.constant 0.000000e+00 : f32
    %479 = vector.broadcast %cst_168 : f32 to vector<16x32xf32>
    %480 = arith.maximumf %478, %479 : vector<16x32xf32>
    %c0_169 = arith.constant 0 : index
    %c0_170 = arith.constant 0 : index
    %481 = vector.load %arg6[%c0_169, %c0_170] : memref<32x32xf32, #tpu.memory_space<vmem>>, vector<32x32xf32>
    %cst_171 = arith.constant dense<0.000000e+00> : vector<16x32xf32>
    %482 = tpu.matmul %480, %481, %cst_171 {dimension_numbers = #tpu.dot_dimension_numbers<[1], [0], [0], [1], [0, 0, 1, 1], [], []>} : vector<16x32xf32>, vector<32x32xf32>, vector<16x32xf32> -> vector<16x32xf32>
    %c0_172 = arith.constant 0 : index
    %c0_173 = arith.constant 0 : index
    %483 = vector.load %arg7[%c0_172, %c0_173] : memref<1x32xf32, #tpu.memory_space<vmem>>, vector<1x32xf32>
    %484 = vector.broadcast %483 : vector<1x32xf32> to vector<16x32xf32>
    %485 = arith.addf %482, %484 : vector<16x32xf32>
    %486 = arith.addf %485, %473 : vector<16x32xf32>
    %cst_174 = arith.constant dense<0.000000e+00> : vector<16xf32>
    %487 = vector.multi_reduction <add>, %486, %cst_174 [1] : vector<16x32xf32> to vector<16xf32>
    %488 = vector.shape_cast %487 : vector<16xf32> to vector<16x1xf32>
    %cst_175 = arith.constant 3.200000e+01 : f32
    %489 = vector.broadcast %cst_175 : f32 to vector<16x1xf32>
    %490 = arith.divf %488, %489 : vector<16x1xf32>
    %491 = vector.broadcast %490 : vector<16x1xf32> to vector<16x32xf32>
    %492 = arith.subf %486, %491 : vector<16x32xf32>
    %493 = arith.mulf %492, %492 : vector<16x32xf32>
    %cst_176 = arith.constant dense<0.000000e+00> : vector<16xf32>
    %494 = vector.multi_reduction <add>, %493, %cst_176 [1] : vector<16x32xf32> to vector<16xf32>
    %495 = vector.shape_cast %494 : vector<16xf32> to vector<16x1xf32>
    %cst_177 = arith.constant 3.200000e+01 : f32
    %496 = vector.broadcast %cst_177 : f32 to vector<16x1xf32>
    %497 = arith.divf %495, %496 : vector<16x1xf32>
    %498 = vector.broadcast %490 : vector<16x1xf32> to vector<16x32xf32>
    %499 = arith.subf %486, %498 : vector<16x32xf32>
    %cst_178 = arith.constant 9.99999996E-13 : f32
    %500 = vector.broadcast %cst_178 : f32 to vector<16x1xf32>
    %501 = arith.addf %497, %500 : vector<16x1xf32>
    %502 = math.rsqrt %501 : vector<16x1xf32>
    %503 = vector.broadcast %502 : vector<16x1xf32> to vector<16x32xf32>
    %504 = arith.mulf %499, %503 : vector<16x32xf32>
    %c0_179 = arith.constant 0 : index
    %c0_180 = arith.constant 0 : index
    %505 = vector.load %arg8[%c0_179, %c0_180] : memref<1x32xf32, #tpu.memory_space<vmem>>, vector<1x32xf32>
    %506 = vector.broadcast %505 : vector<1x32xf32> to vector<16x32xf32>
    %507 = arith.mulf %504, %506 : vector<16x32xf32>
    %c0_181 = arith.constant 0 : index
    %c0_182 = arith.constant 0 : index
    %508 = vector.load %arg9[%c0_181, %c0_182] : memref<1x32xf32, #tpu.memory_space<vmem>>, vector<1x32xf32>
    %509 = vector.broadcast %508 : vector<1x32xf32> to vector<16x32xf32>
    %510 = arith.addf %507, %509 : vector<16x32xf32>
    %511 = vector.shape_cast %510 : vector<16x32xf32> to vector<2x8x32xf32>
    %c0_183 = arith.constant 0 : index
    %c0_184 = arith.constant 0 : index
    %c0_185 = arith.constant 0 : index
    %512 = vector.load %arg10[%c0_183, %c0_184, %c0_185] : memref<2x8x32xf32, #tpu.memory_space<vmem>>, vector<2x8x32xf32>
    tpu.vector_store %arg10[%c0_183, %c0_184, %c0_185], %511 {strides = array<i32>} : memref<2x8x32xf32, #tpu.memory_space<vmem>>, vector<2x8x32xf32>,
    return
  }
  func.func @transform_0(%arg0: i32) -> (i32, i32, i32) {
    %c0_i32 = arith.constant 0 : i32
    %c0_i32_0 = arith.constant 0 : i32
    %c0_i32_1 = arith.constant 0 : i32
    return %arg0, %c0_i32, %c0_i32_0 : i32, i32, i32
  }
  func.func @transform_1(%arg0: i32) -> (i32, i32) {
    %c0_i32 = arith.constant 0 : i32
    %c0_i32_0 = arith.constant 0 : i32
    %c0_i32_1 = arith.constant 0 : i32
    return %c0_i32, %c0_i32_0 : i32, i32
  }
  func.func @transform_2(%arg0: i32) -> (i32, i32) {
    %c0_i32 = arith.constant 0 : i32
    %c0_i32_0 = arith.constant 0 : i32
    %c0_i32_1 = arith.constant 0 : i32
    return %c0_i32, %c0_i32_0 : i32, i32
  }
  func.func @transform_3(%arg0: i32) -> (i32, i32) {
    %c0_i32 = arith.constant 0 : i32
    %c0_i32_0 = arith.constant 0 : i32
    %c0_i32_1 = arith.constant 0 : i32
    return %c0_i32, %c0_i32_0 : i32, i32
  }
  func.func @transform_4(%arg0: i32) -> (i32, i32) {
    %c0_i32 = arith.constant 0 : i32
    %c0_i32_0 = arith.constant 0 : i32
    %c0_i32_1 = arith.constant 0 : i32
    return %c0_i32, %c0_i32_0 : i32, i32
  }
  func.func @transform_5(%arg0: i32) -> (i32, i32) {
    %c0_i32 = arith.constant 0 : i32
    %c0_i32_0 = arith.constant 0 : i32
    %c0_i32_1 = arith.constant 0 : i32
    return %c0_i32, %c0_i32_0 : i32, i32
  }
  func.func @transform_6(%arg0: i32) -> (i32, i32) {
    %c0_i32 = arith.constant 0 : i32
    %c0_i32_0 = arith.constant 0 : i32
    %c0_i32_1 = arith.constant 0 : i32
    return %c0_i32, %c0_i32_0 : i32, i32
  }
  func.func @transform_7(%arg0: i32) -> (i32, i32) {
    %c0_i32 = arith.constant 0 : i32
    %c0_i32_0 = arith.constant 0 : i32
    %c0_i32_1 = arith.constant 0 : i32
    return %c0_i32, %c0_i32_0 : i32, i32
  }
  func.func @transform_8(%arg0: i32) -> (i32, i32) {
    %c0_i32 = arith.constant 0 : i32
    %c0_i32_0 = arith.constant 0 : i32
    %c0_i32_1 = arith.constant 0 : i32
    return %c0_i32, %c0_i32_0 : i32, i32
  }
  func.func @transform_9(%arg0: i32) -> (i32, i32, i32) {
    %c0_i32 = arith.constant 0 : i32
    %c0_i32_0 = arith.constant 0 : i32
    %c0_i32_1 = arith.constant 0 : i32
    return %arg0, %c0_i32, %c0_i32_0 : i32, i32, i32
  }
}

</mosaic_0001>

<bundles_post_ra>
// kernel: tpu_custom_call.1
= control target key start
LH: loop header
LB: loop body
LE: loop exit
PB: predicated region body
PF: predicated region fallthrough
CT: control target
= control target key end

     0   :  { %14 = vsyncpa [#allocation3], 0  ;;  %s2108_s0 = inlined_call_operand.hbm [shape: f32[2,8,32], index: 0, kind: input, shape index: {}]   ;;  %s2109_s1 = inlined_call_operand.hbm [shape: f32[32,32], index: 1, kind: input, shape index: {}]   ;;  %s2110_s2 = inlined_call_operand.vmem [shape: f32[1,32], index: 2, kind: input, shape index: {}]   ;;  %s2111_s3 = inlined_call_operand.hbm [shape: f32[32,32], index: 3, kind: input, shape index: {}]   ;;  %s2112_s4 = inlined_call_operand.vmem [shape: f32[1,32], index: 4, kind: input, shape index: {}]   ;;  %s2113_s5 = inlined_call_operand.hbm [shape: f32[32,32], index: 5, kind: input, shape index: {}]   ;;  %s2114_s6 = inlined_call_operand.vmem [shape: f32[1,32], index: 6, kind: input, shape index: {}]   ;;  %s2115_s7 = inlined_call_operand.vmem [shape: f32[1,32], index: 7, kind: input, shape index: {}]   ;;  %s2116_s8 = inlined_call_operand.vmem [shape: f32[1,32], index: 8, kind: input, shape index: {}]   ;;  %s2117_s9 = inlined_call_operand.hbm [shape: f32[2,8,32], index: 9, kind: output, shape index: {}]  }
   0x1   :  { %15 = vsyncpa [#allocation6], 0 }
   0x2   :  { %16 = vsyncpa [#allocation9], 0 }
   0x3   :  { %17 = vsyncpa [#allocation4], 0  ;;  %s1729_s30 = smov [#allocation5]   ;;  %s1730_s11 = smov [#allocation2]  }
   0x4   :  { %s35_s10 = sshll.u32 %s1729_s30, 4  ;;  %s23_s12 = sshll.u32 %s1730_s11, 4  ;;  %s36_s10 = int_to_ptr.vmem [resolvable:$true] %s35_s10  ;;  %s1788_s12 = int_to_ptr.vmem [resolvable:$true] %s23_s12 }
   0x5   :  { %s1611_s15 = scalar_lea.hbm %s2109_s1, 512 }
   0x6   :  { %p1612_p0 = scmp.ne.s32.totalorder %s2109_s1, %s1611_s15  ;;  %p1615_p1 = scmp.lt.u32.totalorder %s1611_s15, %s2109_s1 }
   0x8   :  { %p1617_p2 = pnand %p1615_p1, %p1612_p0 }
   0xa   :  { %1620 = shalt.err (!%p1617_p2)
}
   0xb   :  { %s1621_s20 = scalar_lea.vmem %s36_s10, 512  ;;  %p1626_p4 = scmp.lt.s32.totalorder %s36_s10, %s36_s10 }
   0xc   :  { %p1622_p3 = scmp.ne.s32.totalorder %s36_s10, %s1621_s20  ;;  %p1627_p5 = scmp.lt.s32.totalorder %s1621_s20, %s1621_s20 }
   0xe   :  { %p1628_p6 = por %p1627_p5, %p1626_p4 }
  0x10   :  { %p1629_p7 = pnand %p1628_p6, %p1622_p3 }
  0x12   :  { %1632 = shalt.err (!%p1629_p7)
}
  0x13   :  { %s1731_s21 = smov 128   ;;  %s1732_s22 = smov 8  }
  0x14   :  { %41 = dma.hbm_to_vmem [thread:$0]  %s2109_s1, 512, %s36_s10, [#allocation6], %s1731_s21, %s1731_s21, %s1732_s22  }
  0x15   :  { %s1633_s27 = scalar_lea.hbm %s2108_s0, 256 }
  0x16   :  { %p1634_p8 = scmp.ne.s32.totalorder %s2108_s0, %s1633_s27  ;;  %p1637_p9 = scmp.lt.u32.totalorder %s1633_s27, %s2108_s0 }
  0x18   :  { %p1639_p10 = pnand %p1637_p9, %p1634_p8 }
  0x1a   :  { %1642 = shalt.err (!%p1639_p10)
}
  0x1b   :  { %s1643_s13 = scalar_lea.vmem %s1788_s12, 256  ;;  %p1648_p12 = scmp.lt.s32.totalorder %s1788_s12, %s1788_s12 }
  0x1c   :  { %p1644_p11 = scmp.ne.s32.totalorder %s1788_s12, %s1643_s13  ;;  %p1649_p13 = scmp.lt.s32.totalorder %s1643_s13, %s1643_s13 }
  0x1e   :  { %p1650_p0 = por %p1649_p13, %p1648_p12 }
  0x20   :  { %p1651_p1 = pnand %p1650_p0, %p1644_p11 }
  0x22   :  { %1654 = shalt.err (!%p1651_p1)
}
  0x23   :  { %29 = dma.hbm_to_vmem [thread:$0]  %s2108_s0, 256, %s1788_s12, [#allocation3], %s1731_s21, %s1731_s21, %s1732_s22  }
  0x24   :  { %s1733_s14 = smov [#allocation7]   ;;  %s1734_s16 = smov [#allocation8]  }
  0x25   :  { %s49_s15 = sshll.u32 %s1733_s14, 4  ;;  %s63_s17 = sshll.u32 %s1734_s16, 4  ;;  %s50_s15 = int_to_ptr.vmem [resolvable:$true] %s49_s15  ;;  %s1825_s17 = int_to_ptr.vmem [resolvable:$true] %s63_s17 }
  0x26   :  { %s1655_s20 = scalar_lea.hbm %s2111_s3, 512 }
  0x27   :  { %p1656_p2 = scmp.ne.s32.totalorder %s2111_s3, %s1655_s20  ;;  %p1659_p3 = scmp.lt.u32.totalorder %s1655_s20, %s2111_s3 }
  0x29   :  { %p1661_p4 = pnand %p1659_p3, %p1656_p2 }
  0x2b   :  { %1664 = shalt.err (!%p1661_p4)
}
  0x2c   :  { %s1665_s0 = scalar_lea.vmem %s50_s15, 512  ;;  %p1670_p6 = scmp.lt.s32.totalorder %s50_s15, %s50_s15 }
  0x2d   :  { %p1666_p5 = scmp.ne.s32.totalorder %s50_s15, %s1665_s0  ;;  %p1671_p7 = scmp.lt.s32.totalorder %s1665_s0, %s1665_s0 }
  0x2f   :  { %p1672_p8 = por %p1671_p7, %p1670_p6 }
  0x31   :  { %p1673_p9 = pnand %p1672_p8, %p1666_p5 }
  0x33   :  { %1676 = shalt.err (!%p1673_p9)
}
  0x34   :  { %55 = dma.hbm_to_vmem [thread:$0]  %s2111_s3, 512, %s50_s15, [#allocation6], %s1731_s21, %s1731_s21, %s1732_s22  }
  0x35   :  { %s1677_s30 = scalar_lea.hbm %s2113_s5, 512 }
  0x36   :  { %p1678_p10 = scmp.ne.s32.totalorder %s2113_s5, %s1677_s30  ;;  %p1681_p11 = scmp.lt.u32.totalorder %s1677_s30, %s2113_s5 }
  0x38   :  { %p1683_p12 = pnand %p1681_p11, %p1678_p10 }
  0x3a   :  { %1686 = shalt.err (!%p1683_p12)
}
  0x3b   :  { %s1687_s14 = scalar_lea.vmem %s1825_s17, 512  ;;  %p1692_p0 = scmp.lt.s32.totalorder %s1825_s17, %s1825_s17 }
  0x3c   :  { %p1688_p13 = scmp.ne.s32.totalorder %s1825_s17, %s1687_s14  ;;  %p1693_p1 = scmp.lt.s32.totalorder %s1687_s14, %s1687_s14 }
  0x3e   :  { %p1694_p2 = por %p1693_p1, %p1692_p0 }
  0x40   :  { %p1695_p3 = pnand %p1694_p2, %p1688_p13 }
  0x42   :  { %1698 = shalt.err (!%p1695_p3)
}
  0x43   :  { %69 = dma.hbm_to_vmem [thread:$0]  %s2113_s5, 512, %s1825_s17, [#allocation9], %s1731_s21, %s1731_s21, %s1732_s22  }
  0x44   :  { %1721 = dma.done.wait [#allocation3], 256  }
  0x45   :  { %1722 = vsyncadd [#allocation3], 4294967040 }
  0x46   :  { %1723 = dma.done.wait [#allocation6], 1024  }
  0x47   :  { %1724 = vsyncadd [#allocation6], 4294966272 }
  0x48   :  { %1725 = dma.done.wait [#allocation9], 512  }
  0x49   :  { %1726 = vsyncadd [#allocation9], 4294966784  ;;  %vm101_vm0 = vcmask 261120   ;;  %v90_v0 = vld [vmem:[#allocation5] sm:$0xff]  ;;  %v91_v1 = vld [vmem:[#allocation5 + $0x8] sm:$0xff]  ;;  %v1735_v8 = vmov 0.0  }
  0x4a   :  { %v92_v2 = vld [vmem:[#allocation5 + $0x10] sm:$0xff]  ;;  %v1570_v3 = vpack.c.bf16 %v91_v1, %v90_v0  ;;  %v93_v4 = vld [vmem:[#allocation5 + $0x18] sm:$0xff]  ;;  %1528 = vmatprep.subr.mxu1 %v1735_v8  ;;  %vm1736_vm1 = vmmov 0   ;;  %vm333_vm2 = vcmask 64512   ;;  %s1737_s24 = smov [#allocation10]  }
  0x4b   :  { %v88_v5 = vld [vmem:[#allocation2] sm:$0xff]  ;;  %v1574_v6 = vpack.c.bf16 %v93_v4, %v92_v2  ;;  %v89_v7 = vld [vmem:[#allocation2 + $0x8] sm:$0xff]  ;;  %1530 = vmatprep.mubr.msk.f32.mxu1 %vm1736_vm1, %v1735_v8  ;;  %s1398_s25 = sshll.u32 %s1737_s24, 4  ;;  %s1399_s25 = int_to_ptr.vmem [resolvable:$true] %s1398_s25 }
  0x4c   :  { %1525 = vmatprep.mubr.msk.f32.mxu0 %vm101_vm0, %v88_v5  ;;  %1571 = vmatprep.subr.bf16.mxu0 %v1570_v3  ;;  %v1412_v9 = vld [vmem:[%s2110_s2] ss:$0 sm:$0xff]  ;;  %s1699_s26 = scalar_lea.vmem %s1399_s25, 256  ;;  %p1704_p5 = scmp.lt.s32.totalorder %s1399_s25, %s1399_s25 }
  0x4d   :  { %1573 = vmatpush3.bf16.msra.mxu0 %v1570_v3  ;;  %1529 = vmatpush3.xpose.msk.msra.mxu1 %vm101_vm0, %v88_v5  ;;  %p1700_p4 = scmp.ne.s32.totalorder %s1399_s25, %s1699_s26  ;;  %p1705_p6 = scmp.lt.s32.totalorder %s1699_s26, %s1699_s26 }
  0x4e   :  { %1575 = vmatprep.subr.bf16.mxu0 %v1574_v6  ;;  %1533 = vmatprep.subr.mxu1 %v1735_v8 }
  0x4f   :  { %p1706_p7 = por %p1705_p6, %p1704_p5 }
  0x51   :  { %1577 = vmatpush3.bf16.msra.mxu0 %v1574_v6  ;;  %p1707_p8 = pnand %p1706_p7, %p1700_p4 }
  0x52   :  { %1538 = vmatprep.subr.mxu0 %v1735_v8 }
  0x54   :  { %1526 = vmatmul.mubr.msk.f32.vlgmr.msra.gmra.mrb[0].mxu0 %vm101_vm0, %v89_v7 }
  0x55   :  { %1539 = vmatpush3.msra.mxu0 %v88_v5  ;;  %1540 = vmatprep.mubr.msk.f32.mxu0 %vm1736_vm1, %v1735_v8 }
 0x127   :  { %v1527_v10 = vpop.f32.mrb[0].mxu0 }
 0x128   :  { %v174_v11 = vpop.f32.mrb[1].mxu0  ;;  %v180_v13 = vadd.f32 %v1527_v10, %v1412_v9 }
 0x129   :  { %v175_v12 = vadd.f32 %v1412_v9, %v174_v11 }
 0x12a   :  { %v184_v15 = vmax.f32 %v180_v13, 0.0 }
 0x12b   :  { %v183_v14 = vmax.f32 %v175_v12, 0.0 }
 0x12d   :  { %1531 = vmatmul.mubr.msk.f32.vlgmr.msra.gmra.mrb[0].mxu1 %vm101_vm0, %v183_v14 }
 0x12e   :  { %1534 = vmatpush3.xpose.msk.msra.mxu1 %vm101_vm0, %v89_v7  ;;  %1535 = vmatprep.mubr.msk.f32.mxu1 %vm1736_vm1, %v1735_v8 }
 0x12f   :  { %1543 = vmatprep.subr.mxu1 %v1735_v8 }
 0x131   :  { %1536 = vmatmul.mubr.msk.f32.vlgmr.msra.gmra.mrb[2].mxu1 %vm101_vm0, %v184_v15 }
 0x132   :  { %1544 = vmatpush3.msra.mxu1 %v89_v7  ;;  %1545 = vmatprep.mubr.msk.f32.mxu1 %vm1736_vm1, %v1735_v8 }
 0x200   :  { %v254_v16 = vpop.f32.mrb[0].mxu1 }
 0x201   :  { %v1875_v17 = vmul.f32 0.088388346, %v254_v16  ;;  %v1532_v18 = vpop.f32.mrb[1].mxu1 }
 0x203   :  { %v334_v19 = vsel %vm333_vm2, %v1875_v17, -inf }
 0x204   :  { %335 = vmax.xlane.f32.xlu0 %v334_v19  ;;  %v327_v20 = vpop.f32.mrb[2].mxu1 }
 0x205   :  { %v1879_v21 = vmul.f32 0.088388346, %v327_v20  ;;  %v1537_v22 = vpop.f32.mrb[3].mxu1 }
 0x207   :  { %v337_v23 = vsel %vm333_vm2, %v1879_v21, -inf }
 0x208   :  { %338 = vmax.xlane.f32.xlu0 %v337_v23 }
 0x291   :  { %v336_v24 = vpop.xlane.xlu0 %335 }
 0x292   :  { %v1419_v25 = vadd.f32 -1.0, %v336_v24 }
 0x294   :  { %v356_v26 = vadd.f32 0.3232233, %v1419_v25  ;;  %v342_v27 = vsub.f32 %v1875_v17, %v1419_v25 }
 0x295   :  { %v339_v28 = vpop.xlane.xlu0 %338 }
 0x296   :  { %v1420_v29 = vadd.f32 -1.0, %v339_v28  ;;  %v344_v30 = vmax.f32 %v342_v27, 0.0  ;;  %v358_v31 = vsub.f32 %v1875_v17, %v356_v26 }
 0x298   :  { %v357_v32 = vadd.f32 0.3232233, %v1420_v29  ;;  %v346_v33 = vmul.f32 %v344_v30, %v344_v30  ;;  %v360_v34 = vmax.f32 %v358_v31, 0.0  ;;  %v343_v35 = vsub.f32 %v1879_v21, %v1420_v29 }
 0x29a   :  { %v348_v36 = vsel %vm333_vm2, %v346_v33, 0.0  ;;  %v362_v37 = vmul.f32 %v360_v34, %v360_v34  ;;  %v345_v38 = vmax.f32 %v343_v35, 0.0  ;;  %v359_v39 = vsub.f32 %v1879_v21, %v357_v32 }
 0x29b   :  { %349 = vadd.xlane.f32.xlu1 %v348_v36 }
 0x29c   :  { %v347_v40 = vmul.f32 %v345_v38, %v345_v38  ;;  %v361_v41 = vmax.f32 %v359_v39, 0.0  ;;  %v364_v42 = vsel %vm333_vm2, %v362_v37, 0.0 }
 0x29e   :  { %v351_v43 = vsel %vm333_vm2, %v347_v40, 0.0  ;;  %v363_v44 = vmul.f32 %v361_v41, %v361_v41 }
 0x29f   :  { %365 = vadd.xlane.f32.xlu1 %v364_v42  ;;  %352 = vadd.xlane.f32.xlu0 %v351_v43 }
 0x2a0   :  { %v367_v45 = vsel %vm333_vm2, %v363_v44, 0.0 }
 0x2a3   :  { %368 = vadd.xlane.f32.xlu1 %v367_v45 }
 0x328   :  { %v350_v46 = vpop.xlane.xlu1 %349 }
 0x329   :  { %v1891_v48 = vadd.f32 -1.0, %v350_v46 }
 0x32c   :  { %v366_v47 = vpop.xlane.xlu1 %365  ;;  %v353_v50 = vpop.xlane.xlu0 %352 }
 0x32d   :  { %v1423_v49 = vadd.f32 -1.0, %v366_v47  ;;  %v1894_v53 = vadd.f32 -1.0, %v353_v50 }
 0x32f   :  { %v372_v51 = vmul.f32 %v1423_v49, %v1891_v48 }
 0x330   :  { %v369_v52 = vpop.xlane.xlu1 %368 }
 0x331   :  { %vm374_vm3 = vcmp.ge.f32.partialorder %v372_v51, 0.0  ;;  %v1424_v54 = vadd.f32 -1.0, %v369_v52 }
 0x332   :  { %v376_v55 = vsel %vm374_vm3, %v356_v26, %v1419_v25 }
 0x333   :  { %v373_v56 = vmul.f32 %v1424_v54, %v1894_v53  ;;  %v378_v57 = vadd.f32 0.16161165, %v376_v55 }
 0x335   :  { %vm375_vm4 = vcmp.ge.f32.partialorder %v373_v56, 0.0  ;;  %v380_v58 = vsub.f32 %v1875_v17, %v378_v57 }
 0x336   :  { %v377_v59 = vsel %vm375_vm4, %v357_v32, %v1420_v29 }
 0x337   :  { %v382_v60 = vmax.f32 %v380_v58, 0.0  ;;  %v379_v61 = vadd.f32 0.16161165, %v377_v59 }
 0x339   :  { %v384_v62 = vmul.f32 %v382_v60, %v382_v60  ;;  %v381_v63 = vsub.f32 %v1879_v21, %v379_v61 }
 0x33b   :  { %v386_v0 = vsel %vm333_vm2, %v384_v62, 0.0  ;;  %v383_v1 = vmax.f32 %v381_v63, 0.0 }
 0x33c   :  { %387 = vadd.xlane.f32.xlu0 %v386_v0 }
 0x33d   :  { %v385_v2 = vmul.f32 %v383_v1, %v383_v1 }
 0x33f   :  { %v389_v3 = vsel %vm333_vm2, %v385_v2, 0.0 }
 0x340   :  { %390 = vadd.xlane.f32.xlu1 %v389_v3 }
 0x3c9   :  { %v388_v4 = vpop.xlane.xlu0 %387 }
 0x3ca   :  { %v1425_v5 = vadd.f32 -1.0, %v388_v4 }
 0x3cc   :  { %v394_v6 = vmul.f32 %v1425_v5, %v1891_v48 }
 0x3cd   :  { %v391_v7 = vpop.xlane.xlu1 %390 }
 0x3ce   :  { %vm396_vm5 = vcmp.ge.f32.partialorder %v394_v6, 0.0  ;;  %v1426_v8 = vadd.f32 -1.0, %v391_v7 }
 0x3cf   :  { %v398_v9 = vsel %vm396_vm5, %v378_v57, %v376_v55 }
 0x3d0   :  { %v395_v10 = vmul.f32 %v1426_v8, %v1894_v53  ;;  %v400_v11 = vadd.f32 0.08080582, %v398_v9 }
 0x3d2   :  { %vm397_vm6 = vcmp.ge.f32.partialorder %v395_v10, 0.0  ;;  %v402_v12 = vsub.f32 %v1875_v17, %v400_v11 }
 0x3d3   :  { %v399_v13 = vsel %vm397_vm6, %v379_v61, %v377_v59 }
 0x3d4   :  { %v404_v14 = vmax.f32 %v402_v12, 0.0  ;;  %v401_v15 = vadd.f32 0.08080582, %v399_v13 }
 0x3d6   :  { %v406_v16 = vmul.f32 %v404_v14, %v404_v14  ;;  %v403_v18 = vsub.f32 %v1879_v21, %v401_v15 }
 0x3d8   :  { %v408_v19 = vsel %vm333_vm2, %v406_v16, 0.0  ;;  %v405_v20 = vmax.f32 %v403_v18, 0.0 }
 0x3d9   :  { %409 = vadd.xlane.f32.xlu0 %v408_v19 }
 0x3da   :  { %v407_v22 = vmul.f32 %v405_v20, %v405_v20 }
 0x3dc   :  { %v411_v23 = vsel %vm333_vm2, %v407_v22, 0.0 }
 0x3dd   :  { %412 = vadd.xlane.f32.xlu1 %v411_v23 }
 0x466   :  { %v410_v24 = vpop.xlane.xlu0 %409 }
 0x467   :  { %v1427_v25 = vadd.f32 -1.0, %v410_v24 }
 0x469   :  { %v416_v26 = vmul.f32 %v1427_v25, %v1891_v48 }
 0x46a   :  { %v413_v27 = vpop.xlane.xlu1 %412 }
 0x46b   :  { %vm418_vm7 = vcmp.ge.f32.partialorder %v416_v26, 0.0  ;;  %v1428_v28 = vadd.f32 -1.0, %v413_v27 }
 0x46c   :  { %v420_v29 = vsel %vm418_vm7, %v400_v11, %v398_v9 }
 0x46d   :  { %v417_v30 = vmul.f32 %v1428_v28, %v1894_v53  ;;  %v422_v31 = vadd.f32 0.04040291, %v420_v29 }
 0x46f   :  { %vm419_vm8 = vcmp.ge.f32.partialorder %v417_v30, 0.0  ;;  %v424_v32 = vsub.f32 %v1875_v17, %v422_v31 }
 0x470   :  { %v421_v33 = vsel %vm419_vm8, %v401_v15, %v399_v13 }
 0x471   :  { %v426_v34 = vmax.f32 %v424_v32, 0.0  ;;  %v423_v35 = vadd.f32 0.04040291, %v421_v33 }
 0x473   :  { %v428_v36 = vmul.f32 %v426_v34, %v426_v34  ;;  %v425_v37 = vsub.f32 %v1879_v21, %v423_v35 }
 0x475   :  { %v430_v38 = vsel %vm333_vm2, %v428_v36, 0.0  ;;  %v427_v39 = vmax.f32 %v425_v37, 0.0 }
 0x476   :  { %431 = vadd.xlane.f32.xlu0 %v430_v38 }
 0x477   :  { %v429_v40 = vmul.f32 %v427_v39, %v427_v39 }
 0x479   :  { %v433_v41 = vsel %vm333_vm2, %v429_v40, 0.0 }
 0x47a   :  { %434 = vadd.xlane.f32.xlu1 %v433_v41 }
 0x503   :  { %v432_v42 = vpop.xlane.xlu0 %431 }
 0x504   :  { %v1429_v43 = vadd.f32 -1.0, %v432_v42 }
 0x506   :  { %v438_v44 = vmul.f32 %v1429_v43, %v1891_v48 }
 0x507   :  { %v435_v45 = vpop.xlane.xlu1 %434 }
 0x508   :  { %vm440_vm9 = vcmp.ge.f32.partialorder %v438_v44, 0.0  ;;  %v1430_v46 = vadd.f32 -1.0, %v435_v45 }
 0x509   :  { %v442_v47 = vsel %vm440_vm9, %v422_v31, %v420_v29 }
 0x50a   :  { %v439_v49 = vmul.f32 %v1430_v46, %v1894_v53  ;;  %v444_v50 = vadd.f32 0.020201456, %v442_v47 }
 0x50c   :  { %vm441_vm10 = vcmp.ge.f32.partialorder %v439_v49, 0.0  ;;  %v446_v51 = vsub.f32 %v1875_v17, %v444_v50 }
 0x50d   :  { %v443_v52 = vsel %vm441_vm10, %v423_v35, %v421_v33 }
 0x50e   :  { %v448_v54 = vmax.f32 %v446_v51, 0.0  ;;  %v445_v55 = vadd.f32 0.020201456, %v443_v52 }
 0x510   :  { %v450_v56 = vmul.f32 %v448_v54, %v448_v54  ;;  %v447_v57 = vsub.f32 %v1879_v21, %v445_v55 }
 0x512   :  { %v452_v58 = vsel %vm333_vm2, %v450_v56, 0.0  ;;  %v449_v59 = vmax.f32 %v447_v57, 0.0 }
 0x513   :  { %453 = vadd.xlane.f32.xlu0 %v452_v58 }
 0x514   :  { %v451_v60 = vmul.f32 %v449_v59, %v449_v59 }
 0x516   :  { %v455_v61 = vsel %vm333_vm2, %v451_v60, 0.0 }
 0x517   :  { %456 = vadd.xlane.f32.xlu1 %v455_v61 }
 0x5a0   :  { %v454_v62 = vpop.xlane.xlu0 %453 }
 0x5a1   :  { %v1431_v63 = vadd.f32 -1.0, %v454_v62 }
 0x5a3   :  { %v460_v0 = vmul.f32 %v1431_v63, %v1891_v48 }
 0x5a4   :  { %v457_v1 = vpop.xlane.xlu1 %456 }
 0x5a5   :  { %vm462_vm11 = vcmp.ge.f32.partialorder %v460_v0, 0.0  ;;  %v1432_v2 = vadd.f32 -1.0, %v457_v1 }
 0x5a6   :  { %v464_v3 = vsel %vm462_vm11, %v444_v50, %v442_v47 }
 0x5a7   :  { %v461_v4 = vmul.f32 %v1432_v2, %v1894_v53  ;;  %v466_v5 = vadd.f32 0.010100728, %v464_v3 }
 0x5a9   :  { %vm463_vm12 = vcmp.ge.f32.partialorder %v461_v4, 0.0  ;;  %v468_v6 = vsub.f32 %v1875_v17, %v466_v5 }
 0x5aa   :  { %v465_v7 = vsel %vm463_vm12, %v445_v55, %v443_v52 }
 0x5ab   :  { %v470_v8 = vmax.f32 %v468_v6, 0.0  ;;  %v467_v9 = vadd.f32 0.010100728, %v465_v7 }
 0x5ad   :  { %v472_v10 = vmul.f32 %v470_v8, %v470_v8  ;;  %v469_v11 = vsub.f32 %v1879_v21, %v467_v9 }
 0x5af   :  { %v474_v12 = vsel %vm333_vm2, %v472_v10, 0.0  ;;  %v471_v13 = vmax.f32 %v469_v11, 0.0 }
 0x5b0   :  { %475 = vadd.xlane.f32.xlu0 %v474_v12 }
 0x5b1   :  { %v473_v14 = vmul.f32 %v471_v13, %v471_v13 }
 0x5b3   :  { %v477_v15 = vsel %vm333_vm2, %v473_v14, 0.0 }
 0x5b4   :  { %478 = vadd.xlane.f32.xlu1 %v477_v15 }
 0x63d   :  { %v476_v16 = vpop.xlane.xlu0 %475 }
 0x63e   :  { %v1433_v18 = vadd.f32 -1.0, %v476_v16 }
 0x640   :  { %v482_v19 = vmul.f32 %v1433_v18, %v1891_v48 }
 0x641   :  { %v479_v20 = vpop.xlane.xlu1 %478 }
 0x642   :  { %vm484_vm13 = vcmp.ge.f32.partialorder %v482_v19, 0.0  ;;  %v1434_v22 = vadd.f32 -1.0, %v479_v20 }
 0x643   :  { %v486_v23 = vsel %vm484_vm13, %v466_v5, %v464_v3 }
 0x644   :  { %v483_v24 = vmul.f32 %v1434_v22, %v1894_v53  ;;  %v488_v25 = vadd.f32 0.005050364, %v486_v23 }
 0x646   :  { %vm485_vm14 = vcmp.ge.f32.partialorder %v483_v24, 0.0  ;;  %v490_v26 = vsub.f32 %v1875_v17, %v488_v25 }
 0x647   :  { %v487_v27 = vsel %vm485_vm14, %v467_v9, %v465_v7 }
 0x648   :  { %v492_v28 = vmax.f32 %v490_v26, 0.0  ;;  %v489_v29 = vadd.f32 0.005050364, %v487_v27 }
 0x64a   :  { %v494_v30 = vmul.f32 %v492_v28, %v492_v28  ;;  %v491_v31 = vsub.f32 %v1879_v21, %v489_v29 }
 0x64c   :  { %v496_v32 = vsel %vm333_vm2, %v494_v30, 0.0  ;;  %v493_v33 = vmax.f32 %v491_v31, 0.0 }
 0x64d   :  { %497 = vadd.xlane.f32.xlu0 %v496_v32 }
 0x64e   :  { %v495_v34 = vmul.f32 %v493_v33, %v493_v33 }
 0x650   :  { %v499_v35 = vsel %vm333_vm2, %v495_v34, 0.0 }
 0x651   :  { %500 = vadd.xlane.f32.xlu1 %v499_v35 }
 0x6da   :  { %v498_v36 = vpop.xlane.xlu0 %497 }
 0x6db   :  { %v1435_v37 = vadd.f32 -1.0, %v498_v36 }
 0x6dd   :  { %v504_v38 = vmul.f32 %v1435_v37, %v1891_v48 }
 0x6de   :  { %v501_v39 = vpop.xlane.xlu1 %500 }
 0x6df   :  { %vm506_vm15 = vcmp.ge.f32.partialorder %v504_v38, 0.0  ;;  %v1436_v40 = vadd.f32 -1.0, %v501_v39 }
 0x6e0   :  { %v508_v41 = vsel %vm506_vm15, %v488_v25, %v486_v23 }
 0x6e1   :  { %v505_v42 = vmul.f32 %v1436_v40, %v1894_v53  ;;  %v510_v43 = vadd.f32 0.002525182, %v508_v41 }
 0x6e3   :  { %vm507_vm1 = vcmp.ge.f32.partialorder %v505_v42, 0.0  ;;  %v512_v44 = vsub.f32 %v1875_v17, %v510_v43 }
 0x6e4   :  { %v509_v45 = vsel %vm507_vm1, %v489_v29, %v487_v27 }
 0x6e5   :  { %v514_v46 = vmax.f32 %v512_v44, 0.0  ;;  %v511_v47 = vadd.f32 0.002525182, %v509_v45 }
 0x6e7   :  { %v516_v49 = vmul.f32 %v514_v46, %v514_v46  ;;  %v513_v50 = vsub.f32 %v1879_v21, %v511_v47 }
 0x6e9   :  { %v518_v51 = vsel %vm333_vm2, %v516_v49, 0.0  ;;  %v515_v52 = vmax.f32 %v513_v50, 0.0 }
 0x6ea   :  { %519 = vadd.xlane.f32.xlu0 %v518_v51 }
 0x6eb   :  { %v517_v54 = vmul.f32 %v515_v52, %v515_v52 }
 0x6ed   :  { %v521_v55 = vsel %vm333_vm2, %v517_v54, 0.0 }
 0x6ee   :  { %522 = vadd.xlane.f32.xlu1 %v521_v55 }
 0x777   :  { %v520_v56 = vpop.xlane.xlu0 %519 }
 0x778   :  { %v1437_v57 = vadd.f32 -1.0, %v520_v56 }
 0x77a   :  { %v526_v58 = vmul.f32 %v1437_v57, %v1891_v48 }
 0x77b   :  { %v523_v59 = vpop.xlane.xlu1 %522 }
 0x77c   :  { %vm528_vm3 = vcmp.ge.f32.partialorder %v526_v58, 0.0  ;;  %v1438_v60 = vadd.f32 -1.0, %v523_v59 }
 0x77d   :  { %v530_v61 = vsel %vm528_vm3, %v510_v43, %v508_v41 }
 0x77e   :  { %v527_v62 = vmul.f32 %v1438_v60, %v1894_v53  ;;  %v532_v63 = vadd.f32 0.001262591, %v530_v61 }
 0x780   :  { %vm529_vm4 = vcmp.ge.f32.partialorder %v527_v62, 0.0  ;;  %v534_v0 = vsub.f32 %v1875_v17, %v532_v63 }
 0x781   :  { %v531_v1 = vsel %vm529_vm4, %v511_v47, %v509_v45 }
 0x782   :  { %v536_v2 = vmax.f32 %v534_v0, 0.0  ;;  %v533_v3 = vadd.f32 0.001262591, %v531_v1 }
 0x784   :  { %v538_v4 = vmul.f32 %v536_v2, %v536_v2  ;;  %v535_v5 = vsub.f32 %v1879_v21, %v533_v3 }
 0x786   :  { %v540_v6 = vsel %vm333_vm2, %v538_v4, 0.0  ;;  %v537_v7 = vmax.f32 %v535_v5, 0.0 }
 0x787   :  { %541 = vadd.xlane.f32.xlu0 %v540_v6 }
 0x788   :  { %v539_v8 = vmul.f32 %v537_v7, %v537_v7 }
 0x78a   :  { %v543_v9 = vsel %vm333_vm2, %v539_v8, 0.0 }
 0x78b   :  { %544 = vadd.xlane.f32.xlu1 %v543_v9 }
 0x814   :  { %v542_v10 = vpop.xlane.xlu0 %541 }
 0x815   :  { %v1439_v11 = vadd.f32 -1.0, %v542_v10 }
 0x817   :  { %v548_v12 = vmul.f32 %v1439_v11, %v1891_v48 }
 0x818   :  { %v545_v13 = vpop.xlane.xlu1 %544 }
 0x819   :  { %vm550_vm5 = vcmp.ge.f32.partialorder %v548_v12, 0.0  ;;  %v1440_v14 = vadd.f32 -1.0, %v545_v13 }
 0x81a   :  { %v552_v15 = vsel %vm550_vm5, %v532_v63, %v530_v61 }
 0x81b   :  { %v549_v16 = vmul.f32 %v1440_v14, %v1894_v53  ;;  %v554_v18 = vadd.f32 0.0006312955, %v552_v15 }
 0x81d   :  { %vm551_vm6 = vcmp.ge.f32.partialorder %v549_v16, 0.0  ;;  %v556_v19 = vsub.f32 %v1875_v17, %v554_v18 }
 0x81e   :  { %v553_v20 = vsel %vm551_vm6, %v533_v3, %v531_v1 }
 0x81f   :  { %v558_v22 = vmax.f32 %v556_v19, 0.0  ;;  %v555_v23 = vadd.f32 0.0006312955, %v553_v20 }
 0x821   :  { %v560_v24 = vmul.f32 %v558_v22, %v558_v22  ;;  %v557_v25 = vsub.f32 %v1879_v21, %v555_v23 }
 0x823   :  { %v562_v26 = vsel %vm333_vm2, %v560_v24, 0.0  ;;  %v559_v27 = vmax.f32 %v557_v25, 0.0 }
 0x824   :  { %563 = vadd.xlane.f32.xlu0 %v562_v26 }
 0x825   :  { %v561_v28 = vmul.f32 %v559_v27, %v559_v27 }
 0x827   :  { %v565_v29 = vsel %vm333_vm2, %v561_v28, 0.0 }
 0x828   :  { %566 = vadd.xlane.f32.xlu1 %v565_v29 }
 0x8b1   :  { %v564_v30 = vpop.xlane.xlu0 %563 }
 0x8b2   :  { %v1441_v31 = vadd.f32 -1.0, %v564_v30 }
 0x8b4   :  { %v570_v32 = vmul.f32 %v1441_v31, %v1891_v48 }
 0x8b5   :  { %v567_v33 = vpop.xlane.xlu1 %566 }
 0x8b6   :  { %vm572_vm7 = vcmp.ge.f32.partialorder %v570_v32, 0.0  ;;  %v1442_v34 = vadd.f32 -1.0, %v567_v33 }
 0x8b7   :  { %v574_v35 = vsel %vm572_vm7, %v554_v18, %v552_v15 }
 0x8b8   :  { %v571_v36 = vmul.f32 %v1442_v34, %v1894_v53  ;;  %v576_v37 = vadd.f32 0.00031564775, %v574_v35 }
 0x8ba   :  { %vm573_vm8 = vcmp.ge.f32.partialorder %v571_v36, 0.0  ;;  %v578_v38 = vsub.f32 %v1875_v17, %v576_v37 }
 0x8bb   :  { %v575_v39 = vsel %vm573_vm8, %v555_v23, %v553_v20 }
 0x8bc   :  { %v580_v40 = vmax.f32 %v578_v38, 0.0  ;;  %v577_v41 = vadd.f32 0.00031564775, %v575_v39 }
 0x8be   :  { %v582_v42 = vmul.f32 %v580_v40, %v580_v40  ;;  %v579_v43 = vsub.f32 %v1879_v21, %v577_v41 }
 0x8c0   :  { %v584_v44 = vsel %vm333_vm2, %v582_v42, 0.0  ;;  %v581_v45 = vmax.f32 %v579_v43, 0.0 }
 0x8c1   :  { %585 = vadd.xlane.f32.xlu0 %v584_v44 }
 0x8c2   :  { %v583_v46 = vmul.f32 %v581_v45, %v581_v45 }
 0x8c4   :  { %v587_v47 = vsel %vm333_vm2, %v583_v46, 0.0 }
 0x8c5   :  { %588 = vadd.xlane.f32.xlu1 %v587_v47 }
 0x94e   :  { %v586_v49 = vpop.xlane.xlu0 %585 }
 0x94f   :  { %v1443_v50 = vadd.f32 -1.0, %v586_v49 }
 0x951   :  { %v592_v51 = vmul.f32 %v1443_v50, %v1891_v48 }
 0x952   :  { %v589_v52 = vpop.xlane.xlu1 %588 }
 0x953   :  { %vm594_vm9 = vcmp.ge.f32.partialorder %v592_v51, 0.0  ;;  %v1444_v54 = vadd.f32 -1.0, %v589_v52 }
 0x954   :  { %v596_v55 = vsel %vm594_vm9, %v576_v37, %v574_v35 }
 0x955   :  { %v593_v56 = vmul.f32 %v1444_v54, %v1894_v53  ;;  %v598_v57 = vadd.f32 0.00015782387, %v596_v55 }
 0x957   :  { %vm595_vm10 = vcmp.ge.f32.partialorder %v593_v56, 0.0  ;;  %v600_v58 = vsub.f32 %v1875_v17, %v598_v57 }
 0x958   :  { %v597_v59 = vsel %vm595_vm10, %v577_v41, %v575_v39 }
 0x959   :  { %v602_v60 = vmax.f32 %v600_v58, 0.0  ;;  %v599_v61 = vadd.f32 0.00015782387, %v597_v59 }
 0x95b   :  { %v604_v62 = vmul.f32 %v602_v60, %v602_v60  ;;  %v601_v63 = vsub.f32 %v1879_v21, %v599_v61 }
 0x95d   :  { %v606_v0 = vsel %vm333_vm2, %v604_v62, 0.0  ;;  %v603_v1 = vmax.f32 %v601_v63, 0.0 }
 0x95e   :  { %607 = vadd.xlane.f32.xlu0 %v606_v0 }
 0x95f   :  { %v605_v2 = vmul.f32 %v603_v1, %v603_v1 }
 0x961   :  { %v609_v3 = vsel %vm333_vm2, %v605_v2, 0.0 }
 0x962   :  { %610 = vadd.xlane.f32.xlu1 %v609_v3 }
 0x9eb   :  { %v608_v4 = vpop.xlane.xlu0 %607 }
 0x9ec   :  { %v1445_v5 = vadd.f32 -1.0, %v608_v4 }
 0x9ee   :  { %v614_v6 = vmul.f32 %v1445_v5, %v1891_v48 }
 0x9ef   :  { %v611_v7 = vpop.xlane.xlu1 %610 }
 0x9f0   :  { %vm616_vm11 = vcmp.ge.f32.partialorder %v614_v6, 0.0  ;;  %v1446_v8 = vadd.f32 -1.0, %v611_v7 }
 0x9f1   :  { %v618_v9 = vsel %vm616_vm11, %v598_v57, %v596_v55 }
 0x9f2   :  { %v615_v10 = vmul.f32 %v1446_v8, %v1894_v53  ;;  %v620_v11 = vadd.f32 7.891194e-05, %v618_v9 }
 0x9f4   :  { %vm617_vm12 = vcmp.ge.f32.partialorder %v615_v10, 0.0  ;;  %v622_v12 = vsub.f32 %v1875_v17, %v620_v11 }
 0x9f5   :  { %v619_v13 = vsel %vm617_vm12, %v599_v61, %v597_v59 }
 0x9f6   :  { %v624_v14 = vmax.f32 %v622_v12, 0.0  ;;  %v621_v15 = vadd.f32 7.891194e-05, %v619_v13 }
 0x9f8   :  { %v626_v16 = vmul.f32 %v624_v14, %v624_v14  ;;  %v623_v18 = vsub.f32 %v1879_v21, %v621_v15 }
 0x9fa   :  { %v628_v19 = vsel %vm333_vm2, %v626_v16, 0.0  ;;  %v625_v20 = vmax.f32 %v623_v18, 0.0 }
 0x9fb   :  { %629 = vadd.xlane.f32.xlu0 %v628_v19 }
 0x9fc   :  { %v627_v22 = vmul.f32 %v625_v20, %v625_v20 }
 0x9fe   :  { %v631_v23 = vsel %vm333_vm2, %v627_v22, 0.0 }
 0x9ff   :  { %632 = vadd.xlane.f32.xlu1 %v631_v23 }
 0xa88   :  { %v630_v24 = vpop.xlane.xlu0 %629 }
 0xa89   :  { %v1447_v25 = vadd.f32 -1.0, %v630_v24 }
 0xa8b   :  { %v636_v26 = vmul.f32 %v1447_v25, %v1891_v48 }
 0xa8c   :  { %v633_v27 = vpop.xlane.xlu1 %632 }
 0xa8d   :  { %vm638_vm13 = vcmp.ge.f32.partialorder %v636_v26, 0.0  ;;  %v1448_v28 = vadd.f32 -1.0, %v633_v27 }
 0xa8e   :  { %v640_v29 = vsel %vm638_vm13, %v620_v11, %v618_v9 }
 0xa8f   :  { %v637_v30 = vmul.f32 %v1448_v28, %v1894_v53  ;;  %v642_v31 = vadd.f32 3.945597e-05, %v640_v29 }
 0xa91   :  { %vm639_vm14 = vcmp.ge.f32.partialorder %v637_v30, 0.0  ;;  %v644_v32 = vsub.f32 %v1875_v17, %v642_v31 }
 0xa92   :  { %v641_v33 = vsel %vm639_vm14, %v621_v15, %v619_v13 }
 0xa93   :  { %v646_v34 = vmax.f32 %v644_v32, 0.0  ;;  %v643_v35 = vadd.f32 3.945597e-05, %v641_v33 }
 0xa95   :  { %v648_v36 = vmul.f32 %v646_v34, %v646_v34  ;;  %v645_v37 = vsub.f32 %v1879_v21, %v643_v35 }
 0xa97   :  { %v650_v38 = vsel %vm333_vm2, %v648_v36, 0.0  ;;  %v647_v39 = vmax.f32 %v645_v37, 0.0 }
 0xa98   :  { %651 = vadd.xlane.f32.xlu0 %v650_v38 }
 0xa99   :  { %v649_v40 = vmul.f32 %v647_v39, %v647_v39 }
 0xa9b   :  { %v653_v41 = vsel %vm333_vm2, %v649_v40, 0.0 }
 0xa9c   :  { %654 = vadd.xlane.f32.xlu1 %v653_v41 }
 0xb25   :  { %v652_v42 = vpop.xlane.xlu0 %651 }
 0xb26   :  { %v1449_v43 = vadd.f32 -1.0, %v652_v42 }
 0xb28   :  { %v658_v44 = vmul.f32 %v1449_v43, %v1891_v48 }
 0xb29   :  { %v655_v45 = vpop.xlane.xlu1 %654 }
 0xb2a   :  { %vm660_vm15 = vcmp.ge.f32.partialorder %v658_v44, 0.0  ;;  %v1450_v46 = vadd.f32 -1.0, %v655_v45 }
 0xb2b   :  { %v662_v47 = vsel %vm660_vm15, %v642_v31, %v640_v29 }
 0xb2c   :  { %v659_v49 = vmul.f32 %v1450_v46, %v1894_v53  ;;  %v664_v50 = vadd.f32 1.9727984e-05, %v662_v47 }
 0xb2e   :  { %vm661_vm1 = vcmp.ge.f32.partialorder %v659_v49, 0.0  ;;  %v666_v51 = vsub.f32 %v1875_v17, %v664_v50 }
 0xb2f   :  { %v663_v52 = vsel %vm661_vm1, %v643_v35, %v641_v33 }
 0xb30   :  { %v668_v54 = vmax.f32 %v666_v51, 0.0  ;;  %v665_v55 = vadd.f32 1.9727984e-05, %v663_v52 }
 0xb32   :  { %v670_v56 = vmul.f32 %v668_v54, %v668_v54  ;;  %v667_v57 = vsub.f32 %v1879_v21, %v665_v55 }
 0xb34   :  { %v672_v58 = vsel %vm333_vm2, %v670_v56, 0.0  ;;  %v669_v59 = vmax.f32 %v667_v57, 0.0 }
 0xb35   :  { %673 = vadd.xlane.f32.xlu0 %v672_v58 }
 0xb36   :  { %v671_v60 = vmul.f32 %v669_v59, %v669_v59 }
 0xb38   :  { %v675_v61 = vsel %vm333_vm2, %v671_v60, 0.0 }
 0xb39   :  { %676 = vadd.xlane.f32.xlu1 %v675_v61 }
 0xbc2   :  { %v674_v62 = vpop.xlane.xlu0 %673 }
 0xbc3   :  { %v1451_v63 = vadd.f32 -1.0, %v674_v62 }
 0xbc5   :  { %v680_v0 = vmul.f32 %v1451_v63, %v1891_v48 }
 0xbc6   :  { %v677_v1 = vpop.xlane.xlu1 %676 }
 0xbc7   :  { %vm682_vm3 = vcmp.ge.f32.partialorder %v680_v0, 0.0  ;;  %v1452_v2 = vadd.f32 -1.0, %v677_v1 }
 0xbc8   :  { %v684_v3 = vsel %vm682_vm3, %v664_v50, %v662_v47 }
 0xbc9   :  { %v681_v4 = vmul.f32 %v1452_v2, %v1894_v53  ;;  %v686_v5 = vadd.f32 9.863992e-06, %v684_v3 }
 0xbcb   :  { %vm683_vm4 = vcmp.ge.f32.partialorder %v681_v4, 0.0  ;;  %v688_v6 = vsub.f32 %v1875_v17, %v686_v5 }
 0xbcc   :  { %v685_v7 = vsel %vm683_vm4, %v665_v55, %v663_v52 }
 0xbcd   :  { %v690_v8 = vmax.f32 %v688_v6, 0.0  ;;  %v687_v9 = vadd.f32 9.863992e-06, %v685_v7 }
 0xbcf   :  { %v692_v10 = vmul.f32 %v690_v8, %v690_v8  ;;  %v689_v11 = vsub.f32 %v1879_v21, %v687_v9 }
 0xbd1   :  { %v694_v12 = vsel %vm333_vm2, %v692_v10, 0.0  ;;  %v691_v13 = vmax.f32 %v689_v11, 0.0 }
 0xbd2   :  { %695 = vadd.xlane.f32.xlu0 %v694_v12 }
 0xbd3   :  { %v693_v14 = vmul.f32 %v691_v13, %v691_v13 }
 0xbd5   :  { %v697_v15 = vsel %vm333_vm2, %v693_v14, 0.0 }
 0xbd6   :  { %698 = vadd.xlane.f32.xlu1 %v697_v15 }
 0xc5f   :  { %v696_v16 = vpop.xlane.xlu0 %695 }
 0xc60   :  { %v1453_v18 = vadd.f32 -1.0, %v696_v16 }
 0xc62   :  { %v702_v19 = vmul.f32 %v1453_v18, %v1891_v48 }
 0xc63   :  { %v699_v20 = vpop.xlane.xlu1 %698 }
 0xc64   :  { %vm704_vm5 = vcmp.ge.f32.partialorder %v702_v19, 0.0  ;;  %v1454_v22 = vadd.f32 -1.0, %v699_v20 }
 0xc65   :  { %v706_v23 = vsel %vm704_vm5, %v686_v5, %v684_v3 }
 0xc66   :  { %v703_v24 = vmul.f32 %v1454_v22, %v1894_v53  ;;  %v708_v25 = vadd.f32 4.931996e-06, %v706_v23 }
 0xc68   :  { %vm705_vm6 = vcmp.ge.f32.partialorder %v703_v24, 0.0  ;;  %v710_v26 = vsub.f32 %v1875_v17, %v708_v25 }
 0xc69   :  { %v707_v27 = vsel %vm705_vm6, %v687_v9, %v685_v7 }
 0xc6a   :  { %v712_v28 = vmax.f32 %v710_v26, 0.0  ;;  %v709_v29 = vadd.f32 4.931996e-06, %v707_v27 }
 0xc6c   :  { %v714_v30 = vmul.f32 %v712_v28, %v712_v28  ;;  %v711_v31 = vsub.f32 %v1879_v21, %v709_v29 }
 0xc6e   :  { %v716_v32 = vsel %vm333_vm2, %v714_v30, 0.0  ;;  %v713_v33 = vmax.f32 %v711_v31, 0.0 }
 0xc6f   :  { %717 = vadd.xlane.f32.xlu0 %v716_v32 }
 0xc70   :  { %v715_v34 = vmul.f32 %v713_v33, %v713_v33 }
 0xc72   :  { %v719_v35 = vsel %vm333_vm2, %v715_v34, 0.0 }
 0xc73   :  { %720 = vadd.xlane.f32.xlu1 %v719_v35 }
 0xcfc   :  { %v718_v36 = vpop.xlane.xlu0 %717 }
 0xcfd   :  { %v1455_v37 = vadd.f32 -1.0, %v718_v36 }
 0xcff   :  { %v724_v38 = vmul.f32 %v1455_v37, %v1891_v48 }
 0xd00   :  { %v721_v39 = vpop.xlane.xlu1 %720 }
 0xd01   :  { %vm726_vm7 = vcmp.ge.f32.partialorder %v724_v38, 0.0  ;;  %v1456_v40 = vadd.f32 -1.0, %v721_v39 }
 0xd02   :  { %v728_v41 = vsel %vm726_vm7, %v708_v25, %v706_v23 }
 0xd03   :  { %v725_v42 = vmul.f32 %v1456_v40, %v1894_v53  ;;  %v730_v43 = vadd.f32 2.465998e-06, %v728_v41 }
 0xd05   :  { %vm727_vm8 = vcmp.ge.f32.partialorder %v725_v42, 0.0  ;;  %v732_v44 = vsub.f32 %v1875_v17, %v730_v43 }
 0xd06   :  { %v729_v45 = vsel %vm727_vm8, %v709_v29, %v707_v27 }
 0xd07   :  { %v734_v46 = vmax.f32 %v732_v44, 0.0  ;;  %v731_v47 = vadd.f32 2.465998e-06, %v729_v45 }
 0xd09   :  { %v736_v49 = vmul.f32 %v734_v46, %v734_v46  ;;  %v733_v50 = vsub.f32 %v1879_v21, %v731_v47 }
 0xd0b   :  { %v738_v51 = vsel %vm333_vm2, %v736_v49, 0.0  ;;  %v735_v52 = vmax.f32 %v733_v50, 0.0 }
 0xd0c   :  { %739 = vadd.xlane.f32.xlu0 %v738_v51 }
 0xd0d   :  { %v737_v54 = vmul.f32 %v735_v52, %v735_v52 }
 0xd0f   :  { %v741_v55 = vsel %vm333_vm2, %v737_v54, 0.0 }
 0xd10   :  { %742 = vadd.xlane.f32.xlu1 %v741_v55 }
 0xd99   :  { %v740_v56 = vpop.xlane.xlu0 %739 }
 0xd9a   :  { %v1457_v57 = vadd.f32 -1.0, %v740_v56 }
 0xd9c   :  { %v746_v58 = vmul.f32 %v1457_v57, %v1891_v48 }
 0xd9d   :  { %v743_v59 = vpop.xlane.xlu1 %742 }
 0xd9e   :  { %vm748_vm9 = vcmp.ge.f32.partialorder %v746_v58, 0.0  ;;  %v1458_v60 = vadd.f32 -1.0, %v743_v59 }
 0xd9f   :  { %v750_v61 = vsel %vm748_vm9, %v730_v43, %v728_v41 }
 0xda0   :  { %v747_v62 = vmul.f32 %v1458_v60, %v1894_v53  ;;  %v752_v63 = vadd.f32 1.232999e-06, %v750_v61 }
 0xda2   :  { %vm749_vm10 = vcmp.ge.f32.partialorder %v747_v62, 0.0  ;;  %v754_v0 = vsub.f32 %v1875_v17, %v752_v63 }
 0xda3   :  { %v751_v1 = vsel %vm749_vm10, %v731_v47, %v729_v45 }
 0xda4   :  { %v756_v2 = vmax.f32 %v754_v0, 0.0  ;;  %v753_v3 = vadd.f32 1.232999e-06, %v751_v1 }
 0xda6   :  { %v758_v4 = vmul.f32 %v756_v2, %v756_v2  ;;  %v755_v5 = vsub.f32 %v1879_v21, %v753_v3 }
 0xda8   :  { %v760_v6 = vsel %vm333_vm2, %v758_v4, 0.0  ;;  %v757_v7 = vmax.f32 %v755_v5, 0.0 }
 0xda9   :  { %761 = vadd.xlane.f32.xlu0 %v760_v6 }
 0xdaa   :  { %v759_v8 = vmul.f32 %v757_v7, %v757_v7 }
 0xdac   :  { %v763_v9 = vsel %vm333_vm2, %v759_v8, 0.0 }
 0xdad   :  { %764 = vadd.xlane.f32.xlu1 %v763_v9 }
 0xe36   :  { %v762_v10 = vpop.xlane.xlu0 %761 }
 0xe37   :  { %v1459_v11 = vadd.f32 -1.0, %v762_v10 }
 0xe39   :  { %v768_v12 = vmul.f32 %v1459_v11, %v1891_v48 }
 0xe3a   :  { %v765_v13 = vpop.xlane.xlu1 %764 }
 0xe3b   :  { %vm770_vm11 = vcmp.ge.f32.partialorder %v768_v12, 0.0  ;;  %v1460_v14 = vadd.f32 -1.0, %v765_v13 }
 0xe3c   :  { %v772_v15 = vsel %vm770_vm11, %v752_v63, %v750_v61 }
 0xe3d   :  { %v769_v16 = vmul.f32 %v1460_v14, %v1894_v53  ;;  %v774_v18 = vadd.f32 6.164995e-07, %v772_v15 }
 0xe3f   :  { %vm771_vm12 = vcmp.ge.f32.partialorder %v769_v16, 0.0  ;;  %v776_v19 = vsub.f32 %v1875_v17, %v774_v18 }
 0xe40   :  { %v773_v20 = vsel %vm771_vm12, %v753_v3, %v751_v1 }
 0xe41   :  { %v778_v22 = vmax.f32 %v776_v19, 0.0  ;;  %v775_v23 = vadd.f32 6.164995e-07, %v773_v20 }
 0xe43   :  { %v780_v24 = vmul.f32 %v778_v22, %v778_v22  ;;  %v777_v25 = vsub.f32 %v1879_v21, %v775_v23 }
 0xe45   :  { %v782_v26 = vsel %vm333_vm2, %v780_v24, 0.0  ;;  %v779_v27 = vmax.f32 %v777_v25, 0.0 }
 0xe46   :  { %783 = vadd.xlane.f32.xlu0 %v782_v26 }
 0xe47   :  { %v781_v28 = vmul.f32 %v779_v27, %v779_v27 }
 0xe49   :  { %v785_v29 = vsel %vm333_vm2, %v781_v28, 0.0 }
 0xe4a   :  { %786 = vadd.xlane.f32.xlu1 %v785_v29 }
 0xed3   :  { %v784_v30 = vpop.xlane.xlu0 %783 }
 0xed4   :  { %v1461_v31 = vadd.f32 -1.0, %v784_v30 }
 0xed6   :  { %v790_v32 = vmul.f32 %v1461_v31, %v1891_v48 }
 0xed7   :  { %v787_v33 = vpop.xlane.xlu1 %786 }
 0xed8   :  { %vm792_vm13 = vcmp.ge.f32.partialorder %v790_v32, 0.0  ;;  %v1462_v34 = vadd.f32 -1.0, %v787_v33 }
 0xed9   :  { %v794_v35 = vsel %vm792_vm13, %v774_v18, %v772_v15 }
 0xeda   :  { %v791_v36 = vmul.f32 %v1462_v34, %v1894_v53  ;;  %v796_v37 = vadd.f32 3.0824975e-07, %v794_v35 }
 0xedc   :  { %vm793_vm14 = vcmp.ge.f32.partialorder %v791_v36, 0.0  ;;  %v798_v38 = vsub.f32 %v1875_v17, %v796_v37 }
 0xedd   :  { %v795_v39 = vsel %vm793_vm14, %v775_v23, %v773_v20 }
 0xede   :  { %v800_v40 = vmax.f32 %v798_v38, 0.0  ;;  %v797_v41 = vadd.f32 3.0824975e-07, %v795_v39 }
 0xee0   :  { %v802_v42 = vmul.f32 %v800_v40, %v800_v40  ;;  %v799_v43 = vsub.f32 %v1879_v21, %v797_v41 }
 0xee2   :  { %v804_v44 = vsel %vm333_vm2, %v802_v42, 0.0  ;;  %v801_v45 = vmax.f32 %v799_v43, 0.0 }
 0xee3   :  { %805 = vadd.xlane.f32.xlu0 %v804_v44 }
 0xee4   :  { %v803_v46 = vmul.f32 %v801_v45, %v801_v45 }
 0xee6   :  { %v807_v47 = vsel %vm333_vm2, %v803_v46, 0.0 }
 0xee7   :  { %808 = vadd.xlane.f32.xlu1 %v807_v47 }
 0xf70   :  { %v806_v49 = vpop.xlane.xlu0 %805 }
 0xf71   :  { %v1463_v50 = vadd.f32 -1.0, %v806_v49 }
 0xf73   :  { %v812_v51 = vmul.f32 %v1463_v50, %v1891_v48 }
 0xf74   :  { %v809_v52 = vpop.xlane.xlu1 %808 }
 0xf75   :  { %vm814_vm15 = vcmp.ge.f32.partialorder %v812_v51, 0.0  ;;  %v1464_v54 = vadd.f32 -1.0, %v809_v52 }
 0xf76   :  { %v816_v55 = vsel %vm814_vm15, %v796_v37, %v794_v35 }
 0xf77   :  { %v813_v56 = vmul.f32 %v1464_v54, %v1894_v53  ;;  %v818_v57 = vadd.f32 1.5412488e-07, %v816_v55 }
 0xf79   :  { %vm815_vm1 = vcmp.ge.f32.partialorder %v813_v56, 0.0  ;;  %v820_v58 = vsub.f32 %v1875_v17, %v818_v57 }
 0xf7a   :  { %v817_v59 = vsel %vm815_vm1, %v797_v41, %v795_v39 }
 0xf7b   :  { %v822_v60 = vmax.f32 %v820_v58, 0.0  ;;  %v819_v61 = vadd.f32 1.5412488e-07, %v817_v59 }
 0xf7d   :  { %v824_v62 = vmul.f32 %v822_v60, %v822_v60  ;;  %v821_v63 = vsub.f32 %v1879_v21, %v819_v61 }
 0xf7f   :  { %v826_v0 = vsel %vm333_vm2, %v824_v62, 0.0  ;;  %v823_v1 = vmax.f32 %v821_v63, 0.0 }
 0xf80   :  { %827 = vadd.xlane.f32.xlu0 %v826_v0 }
 0xf81   :  { %v825_v2 = vmul.f32 %v823_v1, %v823_v1 }
 0xf83   :  { %v829_v3 = vsel %vm333_vm2, %v825_v2, 0.0 }
 0xf84   :  { %830 = vadd.xlane.f32.xlu1 %v829_v3 }
0x100d   :  { %v828_v4 = vpop.xlane.xlu0 %827 }
0x100e   :  { %v1465_v5 = vadd.f32 -1.0, %v828_v4 }
0x1010   :  { %v834_v6 = vmul.f32 %v1465_v5, %v1891_v48 }
0x1011   :  { %v831_v7 = vpop.xlane.xlu1 %830 }
0x1012   :  { %vm836_vm3 = vcmp.ge.f32.partialorder %v834_v6, 0.0  ;;  %v1466_v8 = vadd.f32 -1.0, %v831_v7 }
0x1013   :  { %v838_v9 = vsel %vm836_vm3, %v818_v57, %v816_v55 }
0x1014   :  { %v835_v10 = vmul.f32 %v1466_v8, %v1894_v53  ;;  %v840_v11 = vadd.f32 7.706244e-08, %v838_v9 }
0x1016   :  { %vm837_vm4 = vcmp.ge.f32.partialorder %v835_v10, 0.0  ;;  %v842_v12 = vsub.f32 %v1875_v17, %v840_v11 }
0x1017   :  { %v839_v13 = vsel %vm837_vm4, %v819_v61, %v817_v59 }
0x1018   :  { %v844_v14 = vmax.f32 %v842_v12, 0.0  ;;  %v841_v15 = vadd.f32 7.706244e-08, %v839_v13 }
0x101a   :  { %v846_v16 = vmul.f32 %v844_v14, %v844_v14  ;;  %v843_v18 = vsub.f32 %v1879_v21, %v841_v15 }
0x101c   :  { %v848_v19 = vsel %vm333_vm2, %v846_v16, 0.0  ;;  %v845_v20 = vmax.f32 %v843_v18, 0.0 }
0x101d   :  { %849 = vadd.xlane.f32.xlu0 %v848_v19 }
0x101e   :  { %v847_v22 = vmul.f32 %v845_v20, %v845_v20 }
0x1020   :  { %v851_v23 = vsel %vm333_vm2, %v847_v22, 0.0 }
0x1021   :  { %852 = vadd.xlane.f32.xlu1 %v851_v23 }
0x10aa   :  { %v850_v24 = vpop.xlane.xlu0 %849 }
0x10ab   :  { %v1467_v25 = vadd.f32 -1.0, %v850_v24 }
0x10ad   :  { %v856_v26 = vmul.f32 %v1467_v25, %v1891_v48 }
0x10ae   :  { %v853_v27 = vpop.xlane.xlu1 %852 }
0x10af   :  { %vm858_vm5 = vcmp.ge.f32.partialorder %v856_v26, 0.0  ;;  %v1468_v28 = vadd.f32 -1.0, %v853_v27 }
0x10b0   :  { %v860_v29 = vsel %vm858_vm5, %v840_v11, %v838_v9 }
0x10b1   :  { %v857_v30 = vmul.f32 %v1468_v28, %v1894_v53  ;;  %v862_v31 = vadd.f32 3.853122e-08, %v860_v29 }
0x10b3   :  { %vm859_vm6 = vcmp.ge.f32.partialorder %v857_v30, 0.0  ;;  %v864_v32 = vsub.f32 %v1875_v17, %v862_v31 }
0x10b4   :  { %v861_v33 = vsel %vm859_vm6, %v841_v15, %v839_v13 }
0x10b5   :  { %v866_v34 = vmax.f32 %v864_v32, 0.0  ;;  %v863_v35 = vadd.f32 3.853122e-08, %v861_v33 }
0x10b7   :  { %v868_v36 = vmul.f32 %v866_v34, %v866_v34  ;;  %v865_v37 = vsub.f32 %v1879_v21, %v863_v35 }
0x10b9   :  { %v870_v38 = vsel %vm333_vm2, %v868_v36, 0.0  ;;  %v867_v39 = vmax.f32 %v865_v37, 0.0 }
0x10ba   :  { %871 = vadd.xlane.f32.xlu0 %v870_v38 }
0x10bb   :  { %v869_v40 = vmul.f32 %v867_v39, %v867_v39 }
0x10bd   :  { %v873_v41 = vsel %vm333_vm2, %v869_v40, 0.0 }
0x10be   :  { %874 = vadd.xlane.f32.xlu1 %v873_v41 }
0x1147   :  { %v872_v42 = vpop.xlane.xlu0 %871 }
0x1148   :  { %v1469_v43 = vadd.f32 -1.0, %v872_v42 }
0x114a   :  { %v878_v44 = vmul.f32 %v1469_v43, %v1891_v48 }
0x114b   :  { %v875_v45 = vpop.xlane.xlu1 %874 }
0x114c   :  { %vm880_vm7 = vcmp.ge.f32.partialorder %v878_v44, 0.0  ;;  %v1470_v46 = vadd.f32 -1.0, %v875_v45 }
0x114d   :  { %v882_v47 = vsel %vm880_vm7, %v862_v31, %v860_v29 }
0x114e   :  { %v879_v49 = vmul.f32 %v1470_v46, %v1894_v53  ;;  %v884_v50 = vadd.f32 1.926561e-08, %v882_v47 }
0x1150   :  { %vm881_vm8 = vcmp.ge.f32.partialorder %v879_v49, 0.0  ;;  %v886_v51 = vsub.f32 %v1875_v17, %v884_v50 }
0x1151   :  { %v883_v52 = vsel %vm881_vm8, %v863_v35, %v861_v33 }
0x1152   :  { %v888_v54 = vmax.f32 %v886_v51, 0.0  ;;  %v885_v55 = vadd.f32 1.926561e-08, %v883_v52 }
0x1154   :  { %v890_v56 = vmul.f32 %v888_v54, %v888_v54  ;;  %v887_v57 = vsub.f32 %v1879_v21, %v885_v55 }
0x1156   :  { %v892_v58 = vsel %vm333_vm2, %v890_v56, 0.0  ;;  %v889_v59 = vmax.f32 %v887_v57, 0.0 }
0x1157   :  { %893 = vadd.xlane.f32.xlu0 %v892_v58 }
0x1158   :  { %v891_v60 = vmul.f32 %v889_v59, %v889_v59 }
0x115a   :  { %v895_v61 = vsel %vm333_vm2, %v891_v60, 0.0 }
0x115b   :  { %896 = vadd.xlane.f32.xlu1 %v895_v61 }
0x11e4   :  { %v894_v62 = vpop.xlane.xlu0 %893 }
0x11e5   :  { %v1471_v63 = vadd.f32 -1.0, %v894_v62 }
0x11e7   :  { %v900_v0 = vmul.f32 %v1471_v63, %v1891_v48 }
0x11e8   :  { %v897_v1 = vpop.xlane.xlu1 %896 }
0x11e9   :  { %vm902_vm9 = vcmp.ge.f32.partialorder %v900_v0, 0.0  ;;  %v1472_v2 = vadd.f32 -1.0, %v897_v1 }
0x11ea   :  { %v904_v3 = vsel %vm902_vm9, %v884_v50, %v882_v47 }
0x11eb   :  { %v901_v4 = vmul.f32 %v1472_v2, %v1894_v53  ;;  %v906_v5 = vadd.f32 9.632805e-09, %v904_v3 }
0x11ed   :  { %vm903_vm10 = vcmp.ge.f32.partialorder %v901_v4, 0.0  ;;  %v908_v6 = vsub.f32 %v1875_v17, %v906_v5 }
0x11ee   :  { %v905_v7 = vsel %vm903_vm10, %v885_v55, %v883_v52 }
0x11ef   :  { %v910_v8 = vmax.f32 %v908_v6, 0.0  ;;  %v907_v9 = vadd.f32 9.632805e-09, %v905_v7 }
0x11f1   :  { %v912_v10 = vmul.f32 %v910_v8, %v910_v8  ;;  %v909_v11 = vsub.f32 %v1879_v21, %v907_v9 }
0x11f3   :  { %v914_v12 = vsel %vm333_vm2, %v912_v10, 0.0  ;;  %v911_v13 = vmax.f32 %v909_v11, 0.0 }
0x11f4   :  { %915 = vadd.xlane.f32.xlu0 %v914_v12 }
0x11f5   :  { %v913_v14 = vmul.f32 %v911_v13, %v911_v13 }
0x11f7   :  { %v917_v15 = vsel %vm333_vm2, %v913_v14, 0.0 }
0x11f8   :  { %918 = vadd.xlane.f32.xlu1 %v917_v15 }
0x1281   :  { %v916_v16 = vpop.xlane.xlu0 %915 }
0x1282   :  { %v1473_v18 = vadd.f32 -1.0, %v916_v16 }
0x1284   :  { %v922_v19 = vmul.f32 %v1473_v18, %v1891_v48 }
0x1285   :  { %v919_v20 = vpop.xlane.xlu1 %918 }
0x1286   :  { %vm924_vm11 = vcmp.ge.f32.partialorder %v922_v19, 0.0  ;;  %v1474_v22 = vadd.f32 -1.0, %v919_v20 }
0x1287   :  { %v926_v23 = vsel %vm924_vm11, %v906_v5, %v904_v3 }
0x1288   :  { %v923_v24 = vmul.f32 %v1474_v22, %v1894_v53  ;;  %v928_v25 = vadd.f32 4.8164024e-09, %v926_v23 }
0x128a   :  { %vm925_vm12 = vcmp.ge.f32.partialorder %v923_v24, 0.0  ;;  %v930_v26 = vsub.f32 %v1875_v17, %v928_v25 }
0x128b   :  { %v927_v27 = vsel %vm925_vm12, %v907_v9, %v905_v7 }
0x128c   :  { %v932_v28 = vmax.f32 %v930_v26, 0.0  ;;  %v929_v29 = vadd.f32 4.8164024e-09, %v927_v27 }
0x128e   :  { %v934_v30 = vmul.f32 %v932_v28, %v932_v28  ;;  %v931_v31 = vsub.f32 %v1879_v21, %v929_v29 }
0x1290   :  { %v936_v32 = vsel %vm333_vm2, %v934_v30, 0.0  ;;  %v933_v33 = vmax.f32 %v931_v31, 0.0 }
0x1291   :  { %937 = vadd.xlane.f32.xlu0 %v936_v32 }
0x1292   :  { %v935_v34 = vmul.f32 %v933_v33, %v933_v33 }
0x1294   :  { %v939_v35 = vsel %vm333_vm2, %v935_v34, 0.0 }
0x1295   :  { %940 = vadd.xlane.f32.xlu1 %v939_v35  ;;  %v1160_v35 = vld [vmem:[#allocation7 + $0x10] sm:$0xff] }
0x131e   :  { %v938_v36 = vpop.xlane.xlu0 %937 }
0x131f   :  { %v1475_v37 = vadd.f32 -1.0, %v938_v36  ;;  %v1161_v36 = vld [vmem:[#allocation7 + $0x18] sm:$0xff] }
0x1321   :  { %v944_v38 = vmul.f32 %v1475_v37, %v1891_v48  ;;  %v1582_v37 = vpack.c.bf16 %v1161_v36, %v1160_v35 }
0x1322   :  { %v941_v39 = vpop.xlane.xlu1 %940 }
0x1323   :  { %vm946_vm13 = vcmp.ge.f32.partialorder %v944_v38, 0.0  ;;  %v1476_v40 = vadd.f32 -1.0, %v941_v39  ;;  %v1252_v38 = vld [vmem:[#allocation8] sm:$0xff]  ;;  %v1253_v39 = vld [vmem:[#allocation8 + $0x8] sm:$0xff] }
0x1324   :  { %v948_v41 = vsel %vm946_vm13, %v928_v25, %v926_v23 }
0x1325   :  { %v945_v42 = vmul.f32 %v1476_v40, %v1894_v53  ;;  %v950_v43 = vadd.f32 2.4082012e-09, %v948_v41  ;;  %v1586_v40 = vpack.c.bf16 %v1253_v39, %v1252_v38 }
0x1327   :  { %vm947_vm14 = vcmp.ge.f32.partialorder %v945_v42, 0.0  ;;  %v952_v44 = vsub.f32 %v1875_v17, %v950_v43  ;;  %1587 = vmatprep.subr.bf16.mxu1 %v1586_v40 }
0x1328   :  { %v949_v45 = vsel %vm947_vm14, %v929_v29, %v927_v27  ;;  %v1158_v29 = vld [vmem:[#allocation7] sm:$0xff] }
0x1329   :  { %v954_v46 = vmax.f32 %v952_v44, 0.0  ;;  %v951_v47 = vadd.f32 2.4082012e-09, %v949_v45 }
0x132b   :  { %v956_v49 = vmul.f32 %v954_v46, %v954_v46  ;;  %v953_v50 = vsub.f32 %v1879_v21, %v951_v47  ;;  %v1255_v46 = vld [vmem:[#allocation8 + $0x18] sm:$0xff] }
0x132d   :  { %v958_v51 = vsel %vm333_vm2, %v956_v49, 0.0  ;;  %v955_v52 = vmax.f32 %v953_v50, 0.0  ;;  %v1483_v49 = vld [vmem:[%s2112_s4] ss:$0 sm:$0xff] }
0x132e   :  { %959 = vadd.xlane.f32.xlu0 %v958_v51 }
0x132f   :  { %v957_v54 = vmul.f32 %v955_v52, %v955_v52 }
0x1331   :  { %v961_v55 = vsel %vm333_vm2, %v957_v54, 0.0 }
0x1332   :  { %962 = vadd.xlane.f32.xlu1 %v961_v55 }
0x13bb   :  { %v960_v56 = vpop.xlane.xlu0 %959 }
0x13bc   :  { %v1477_v57 = vadd.f32 -1.0, %v960_v56 }
0x13be   :  { %v966_v58 = vmul.f32 %v1477_v57, %v1891_v48  ;;  %v1486_v57 = vld [vmem:[%s2114_s6] ss:$0 sm:$0xff] }
0x13bf   :  { %v963_v59 = vpop.xlane.xlu1 %962 }
0x13c0   :  { %vm968_vm15 = vcmp.ge.f32.partialorder %v966_v58, 0.0  ;;  %v1478_v60 = vadd.f32 -1.0, %v963_v59 }
0x13c1   :  { %v970_v61 = vsel %vm968_vm15, %v950_v43, %v948_v41 }
0x13c2   :  { %v967_v62 = vmul.f32 %v1478_v60, %v1894_v53  ;;  %v972_v63 = vadd.f32 1.2041006e-09, %v970_v61 }
0x13c4   :  { %vm969_vm1 = vcmp.ge.f32.partialorder %v967_v62, 0.0  ;;  %v974_v0 = vsub.f32 %v1875_v17, %v972_v63 }
0x13c5   :  { %v971_v1 = vsel %vm969_vm1, %v951_v47, %v949_v45  ;;  %v1254_v45 = vld [vmem:[#allocation8 + $0x10] sm:$0xff] }
0x13c6   :  { %v976_v2 = vmax.f32 %v974_v0, 0.0  ;;  %v973_v3 = vadd.f32 1.2041006e-09, %v971_v1  ;;  %v1590_v47 = vpack.c.bf16 %v1255_v46, %v1254_v45 }
0x13c8   :  { %v978_v4 = vmul.f32 %v976_v2, %v976_v2  ;;  %v975_v5 = vsub.f32 %v1879_v21, %v973_v3 }
0x13ca   :  { %v980_v6 = vsel %vm333_vm2, %v978_v4, 0.0  ;;  %v977_v7 = vmax.f32 %v975_v5, 0.0 }
0x13cb   :  { %981 = vadd.xlane.f32.xlu0 %v980_v6 }
0x13cc   :  { %v979_v8 = vmul.f32 %v977_v7, %v977_v7 }
0x13ce   :  { %v983_v9 = vsel %vm333_vm2, %v979_v8, 0.0 }
0x13cf   :  { %984 = vadd.xlane.f32.xlu1 %v983_v9 }
0x1458   :  { %v982_v10 = vpop.xlane.xlu0 %981 }
0x1459   :  { %v1479_v11 = vadd.f32 -1.0, %v982_v10 }
0x145b   :  { %v988_v12 = vmul.f32 %v1479_v11, %v1891_v48 }
0x145c   :  { %v985_v13 = vpop.xlane.xlu1 %984 }
0x145d   :  { %vm990_vm3 = vcmp.ge.f32.partialorder %v988_v12, 0.0  ;;  %v1480_v14 = vadd.f32 -1.0, %v985_v13 }
0x145e   :  { %v992_v15 = vsel %vm990_vm3, %v972_v63, %v970_v61 }
0x145f   :  { %v989_v16 = vmul.f32 %v1480_v14, %v1894_v53  ;;  %v994_v18 = vadd.f32 6.020503e-10, %v992_v15  ;;  %v1159_v53 = vld [vmem:[#allocation7 + $0x8] sm:$0xff] }
0x1460   :  { %v1578_v30 = vpack.c.bf16 %v1159_v53, %v1158_v29 }
0x1461   :  { %vm991_vm4 = vcmp.ge.f32.partialorder %v989_v16, 0.0  ;;  %v996_v19 = vsub.f32 %v1875_v17, %v994_v18 }
0x1462   :  { %v993_v20 = vsel %vm991_vm4, %v973_v3, %v971_v1  ;;  %1579 = vmatprep.subr.bf16.mxu0 %v1578_v30 }
0x1463   :  { %v998_v22 = vmax.f32 %v996_v19, 0.0  ;;  %v995_v23 = vadd.f32 6.020503e-10, %v993_v20  ;;  %v1489_v20 = vld [vmem:[%s2115_s7] ss:$0 sm:$0xff] }
0x1465   :  { %v1000_v24 = vmul.f32 %v998_v22, %v998_v22  ;;  %v997_v25 = vsub.f32 %v1879_v21, %v995_v23 }
0x1467   :  { %v1002_v26 = vsel %vm333_vm2, %v1000_v24, 0.0  ;;  %v999_v27 = vmax.f32 %v997_v25, 0.0  ;;  %v1490_v25 = vld [vmem:[%s2116_s8] ss:$0 sm:$0xff] }
0x1468   :  { %1003 = vadd.xlane.f32.xlu0 %v1002_v26 }
0x1469   :  { %v1001_v48 = vmul.f32 %v999_v27, %v999_v27 }
0x146b   :  { %v1005_v28 = vsel %vm333_vm2, %v1001_v48, 0.0 }
0x146c   :  { %1006 = vadd.xlane.f32.xlu1 %v1005_v28 }
0x14f5   :  { %v1004_v31 = vpop.xlane.xlu0 %1003 }
0x14f6   :  { %1603 = vrcp.f32 %v1004_v31 }
0x14f9   :  { %v1007_v17 = vpop.xlane.xlu1 %1006 }
0x14fa   :  { %1605 = vrcp.f32 %v1007_v17 }
0x1500   :  { %v1604_v32 = vpop.eup %1603 }
0x1501   :  { %v1009_v33 = vmul.f32 %v1604_v32, %v1000_v24 }
0x1503   :  { %1541 = vmatmul.mubr.msk.f32.vlgmr.msra.gmra.mrb[2].mxu0 %vm333_vm2, %v1009_v33 }
0x1504   :  { %v1606_v21 = vpop.eup %1605  ;;  %1581 = vmatpush3.bf16.msra.mxu0 %v1578_v30 }
0x1505   :  { %v1011_v34 = vmul.f32 %v1606_v21, %v1001_v48  ;;  %1583 = vmatprep.subr.bf16.mxu0 %v1582_v37 }
0x1507   :  { %1546 = vmatmul.mubr.msk.f32.vlgmr.msra.gmra.mrb[4].mxu1 %vm333_vm2, %v1011_v34 }
0x1508   :  { %1585 = vmatpush3.bf16.msra.mxu0 %v1582_v37  ;;  %1589 = vmatpush3.bf16.msra.mxu1 %v1586_v40 }
0x1509   :  { %1591 = vmatprep.subr.bf16.mxu1 %v1590_v47 }
0x150c   :  { %1593 = vmatpush3.bf16.msra.mxu1 %v1590_v47 }
0x15d6   :  { %v1081_v41 = vpop.f32.mrb[2].mxu0 }
0x15d7   :  { %v1542_v42 = vpop.f32.mrb[3].mxu0  ;;  %1556 = vmatprep.mubr.msk.f32.mxu0 %vm101_vm0, %v1081_v41 }
0x15da   :  { %v1154_v43 = vpop.f32.mrb[4].mxu1 }
0x15db   :  { %v1547_v44 = vpop.f32.mrb[5].mxu1  ;;  %1557 = vmatmul.mubr.msk.f32.vlgmr.msra.gmra.mrb[4].mxu0 %vm101_vm0, %v1154_v43 }
0x16ae   :  { %v1558_v50 = vpop.f32.mrb[4].mxu0 }
0x16af   :  { %v1247_v51 = vadd.f32 %v1558_v50, %v1483_v49  ;;  %v1241_v52 = vpop.f32.mrb[5].mxu0 }
0x16b0   :  { %v1242_v54 = vadd.f32 %v1483_v49, %v1241_v52 }
0x16b1   :  { %v1251_v56 = vmax.f32 %v1247_v51, 0.0 }
0x16b2   :  { %v1250_v55 = vmax.f32 %v1242_v54, 0.0 }
0x16b4   :  { %1567 = vmatprep.mubr.msk.f32.mxu1 %vm101_vm0, %v1250_v55 }
0x16b5   :  { %1568 = vmatmul.mubr.msk.f32.vlgmr.msra.gmra.mrb[6].mxu1 %vm101_vm0, %v1251_v56 }
0x1788   :  { %v1569_v58 = vpop.f32.mrb[6].mxu1 }
0x1789   :  { %v1341_v59 = vadd.f32 %v1569_v58, %v1486_v57  ;;  %v1335_v60 = vpop.f32.mrb[7].mxu1 }
0x178a   :  { %v1336_v61 = vadd.f32 %v1486_v57, %v1335_v60 }
0x178b   :  { %v1345_v62 = vadd.f32 %v1341_v59, %v1154_v43 }
0x178c   :  { %v1344_v63 = vadd.f32 %v1336_v61, %v1081_v41 }
0x178d   :  { %v1349_v0 = vsel %vm101_vm0, %v1345_v62, 0.0 }
0x178e   :  { %1350 = vadd.xlane.f32.xlu1 %v1349_v0  ;;  %v1346_v1 = vsel %vm101_vm0, %v1344_v63, 0.0 }
0x178f   :  { %1347 = vadd.xlane.f32.xlu0 %v1346_v1 }
0x181b   :  { %v1351_v2 = vpop.xlane.xlu1 %1350 }
0x181c   :  { %v1354_v3 = vmul.f32 0.03125, %v1351_v2  ;;  %v1348_v4 = vpop.xlane.xlu0 %1347 }
0x181d   :  { %v1353_v5 = vmul.f32 0.03125, %v1348_v4 }
0x181e   :  { %v1356_v6 = vsub.f32 %v1345_v62, %v1354_v3 }
0x181f   :  { %v1355_v7 = vsub.f32 %v1344_v63, %v1353_v5 }
0x1820   :  { %v1358_v8 = vmul.f32 %v1356_v6, %v1356_v6 }
0x1821   :  { %v1357_v9 = vmul.f32 %v1355_v7, %v1355_v7 }
0x1822   :  { %v1362_v10 = vsel %vm101_vm0, %v1358_v8, 0.0 }
0x1823   :  { %1363 = vadd.xlane.f32.xlu1 %v1362_v10  ;;  %v1359_v11 = vsel %vm101_vm0, %v1357_v9, 0.0 }
0x1824   :  { %1360 = vadd.xlane.f32.xlu0 %v1359_v11 }
0x18b0   :  { %v1364_v12 = vpop.xlane.xlu1 %1363 }
0x18b1   :  { %v1366_v13 = vmul.f32 0.03125, %v1364_v12  ;;  %v1361_v14 = vpop.xlane.xlu0 %1360 }
0x18b2   :  { %v1365_v15 = vmul.f32 0.03125, %v1361_v14 }
0x18b3   :  { %v1368_v16 = vadd.f32 1e-12, %v1366_v13 }
0x18b4   :  { %v1367_v18 = vadd.f32 1e-12, %v1365_v15 }
0x18b5   :  { %1607 = vrsqrt.f32 %v1368_v16 }
0x18b6   :  { %1609 = vrsqrt.f32 %v1367_v18 }
0x18bf   :  { %v1608_v19 = vpop.eup %1607 }
0x18c0   :  { %v1610_v22 = vpop.eup %1609  ;;  %v1372_v23 = vmul.f32 %v1608_v19, %v1356_v6 }
0x18c1   :  { %v1371_v24 = vmul.f32 %v1610_v22, %v1355_v7 }
0x18c2   :  { %v1381_v26 = vmul.f32 %v1489_v20, %v1372_v23 }
0x18c3   :  { %v1380_v27 = vmul.f32 %v1489_v20, %v1371_v24 }
0x18c4   :  { %v1390_v48 = vadd.f32 %v1490_v25, %v1381_v26 }
0x18c5   :  { %v1389_v28 = vadd.f32 %v1490_v25, %v1380_v27 }
0x18c6   :  { %1392 = vst.msk [vmem:[#allocation10 + $0x8] sm:$0xff] %vm101_vm0, %v1390_v48 }
0x18c7   :  { %1391 = vst.msk [vmem:[#allocation10] sm:$0xff] %vm101_vm0, %v1389_v28 }
0x18c8   :  { %1710 = shalt.err (!%p1707_p8)
}
0x18c9   :  { %s1711_s0 = scalar_lea.hbm %s2117_s9, 256 }
0x18ca   :  { %p1712_p9 = scmp.ne.s32.totalorder %s2117_s9, %s1711_s0  ;;  %p1715_p10 = scmp.lt.u32.totalorder %s1711_s0, %s2117_s9 }
0x18cc   :  { %p1717_p11 = pnand %p1715_p10, %p1712_p9 }
0x18ce   :  { %1720 = shalt.err (!%p1717_p11)
}
0x18cf   :  { %1404 = dma.vmem_to_hbm [thread:$0]  %s1399_s25, 256, %s2117_s9, [#allocation4], %s1731_s21, %s1731_s21, %s1732_s22  }
0x18d0   :  { %1727 = dma.done.wait [#allocation4], 256  }
0x18d1   :  { %1728 = vsyncadd [#allocation4], 4294967040 }
0x18d2   :  { %1408 = vsyncpa [#allocation3], 1 }
0x18d3   :  { %1409 = vsyncpa [#allocation6], 1 }
0x18d4   :  { %1410 = vsyncpa [#allocation9], 1 }
0x18d5   :  { %1411 = vsyncpa [#allocation4], 1 }

</bundles_post_ra>
